<compile_context>
chip_gen: v5e
topology: v5e:2x2
jax: 0.10.0
libtpu: 0.0.40
codegen_flags: <defaults>
</compile_context>

<pallas_src>
import functools

import jax
import jax.numpy as jnp
from jax.experimental import pallas as pl
from jax.experimental.pallas import tpu as pltpu


def _round_up(a, b):
    return (a + b - 1) // b * b


def _pick_row_tile(h, w, max_rows=256):
    """Largest divisor of `h` whose row-tile has <= max_rows output positions.

    max_rows=256 fills the 256-tall MXU on v6e/v7x (and amortizes ~0.35us
    per-step overhead on v5e, whose MXU height is 128).
    """
    best = 1
    for th in range(1, h + 1):
        if h % th == 0 and th * w <= max_rows:
            best = th
    return best


# ---------------------------------------------------------------------------
# Fused kernel: 3x3 conv (single im2col GEMM, K padded to 128) + bias + ReLU
#               + global average pool + bottleneck/BN head + classifier.
#   grid = (N, H // tile_rows)   -- N "parallel", row-tile axis "arbitrary"
# ---------------------------------------------------------------------------
def conv_pool_head_kernel(x_ref, wconv_ref, bconv_ref, wfeat_ref, bfeat_ref,
                          wlog_ref, blog_ref, feat_ref, logit_ref, acc_ref, *,
                          tile_rows, img_w, hw):
    # x_ref     : (H+2, W+2, C_pad)   bf16   (leading image dim squeezed)
    # wconv_ref : (K_conv, F_pad)     bf16   (K_conv = round_up(9*C_pad, 128))
    # bconv_ref : (1, F_pad)          f32
    # wfeat_ref : (F_pad, D_pad)      bf16   (bottleneck weight * bn_scale)
    # bfeat_ref : (1, D_pad)          f32    (folded BN bias)
    # wlog_ref  : (F_pad, K_pad)      bf16   (fused classifier weight)
    # blog_ref  : (1, K_pad)          f32
    # feat_ref  : (1, D_pad)          f32    out block (written at last t)
    # logit_ref : (1, K_pad)          f32    out block (written at last t)
    # acc_ref   : (1, F_pad)          f32    VMEM scratch (pool accumulator)
    t = pl.program_id(1)
    c_pad = x_ref.shape[-1]
    k_conv = wconv_ref.shape[0]

    @pl.when(t == 0)
    def _init():
        acc_ref[...] = jnp.zeros_like(acc_ref)

    # One aligned superslice load per step; the 9 windows are static slices of
    # the loaded value (register-level), not 9 unaligned VMEM loads.
    row0 = pl.multiple_of(t * tile_rows, tile_rows)
    xsup = x_ref[pl.ds(row0, tile_rows + 2), :, :]      # (tile_rows+2, W+2, C_pad)

    wins = []
    for di in range(3):
        for dj in range(3):
            wins.append(xsup[di:di + tile_rows, dj:dj + img_w, :])
    pad_k = k_conv - 9 * c_pad
    if pad_k > 0:  # static zero K-padding so the GEMM contraction depth is 128
        wins.append(jnp.zeros((tile_rows, img_w, pad_k), jnp.bfloat16))
    patch = jnp.concatenate(wins, axis=-1)              # (tile_rows, W, K_conv)
    patch = patch.reshape(tile_rows * img_w, k_conv)    # lane-dense im2col LHS

    # Single MXU GEMM: M = tile_rows*W, K = 128, N = F_pad.
    conv = jnp.dot(patch, wconv_ref[...], preferred_element_type=jnp.float32)
    conv = jnp.maximum(conv + bconv_ref[...], 0.0)      # bias + ReLU (f32)
    acc_ref[...] += jnp.sum(conv, axis=0, keepdims=True)  # partial pool sum

    @pl.when(t == pl.num_programs(1) - 1)
    def _finalize():
        pooled = (acc_ref[...] * (1.0 / hw)).astype(jnp.bfloat16)   # (1, F_pad)
        # Two independent M=1 GEMMs (fused classifier weights break the
        # feat -> logits dependency chain).
        feat_ref[...] = (jnp.dot(pooled, wfeat_ref[...],
                                 preferred_element_type=jnp.float32)
                         + bfeat_ref[...])
        logit_ref[...] = (jnp.dot(pooled, wlog_ref[...],
                                  preferred_element_type=jnp.float32)
                          + blog_ref[...])


# ---------------------------------------------------------------------------
# Forward (JAX glue around the single pallas_call)
# ---------------------------------------------------------------------------
@functools.partial(jax.jit, static_argnames=("feat_dim", "class_num"))
def guiding_pseudo_sfda_forward(x_nchw, params, *, feat_dim, class_num):
    n, c, h, w = x_nchw.shape
    w_conv = params["w_conv"]                       # (K_conv, F_pad) bf16
    k_conv, f_pad = w_conv.shape
    c_pad = _round_up(c, 8)
    d_pad = params["w_feat"].shape[1]
    k_pad = params["w_logits"].shape[1]

    # NCHW -> NHWC in bf16; single fused halo + channel pad (one HBM buffer).
    x_nhwc = jnp.transpose(x_nchw, (0, 2, 3, 1)).astype(jnp.bfloat16)
    x_pad = jnp.pad(x_nhwc, ((0, 0), (1, 1), (1, 1), (0, c_pad - c)))

    tile_rows = _pick_row_tile(h, w)
    t_steps = h // tile_rows

    cost = pl.CostEstimate(
        flops=2 * n * h * w * k_conv * f_pad
              + 2 * n * f_pad * (d_pad + k_pad),
        transcendentals=0,
        bytes_accessed=(x_pad.size * 2
                        + w_conv.size * 2
                        + params["w_feat"].size * 2
                        + params["w_logits"].size * 2
                        + (params["b_conv"].size + params["b_feat"].size
                           + params["b_logits"].size) * 4
                        + n * (d_pad + k_pad) * 4))

    feat_pad, logit_pad = pl.pallas_call(
        functools.partial(conv_pool_head_kernel, tile_rows=tile_rows,
                          img_w=w, hw=float(h * w)),
        out_shape=(jax.ShapeDtypeStruct((n, 1, d_pad), jnp.float32),
                   jax.ShapeDtypeStruct((n, 1, k_pad), jnp.float32)),
        grid_spec=pltpu.PrefetchScalarGridSpec(
            num_scalar_prefetch=0,
            grid=(n, t_steps),                      # t MUST stay innermost
            in_specs=[
                pl.BlockSpec((None, h + 2, w + 2, c_pad),
                             lambda i, t: (i, 0, 0, 0)),
                pl.BlockSpec((k_conv, f_pad), lambda i, t: (0, 0)),
                pl.BlockSpec((1, f_pad), lambda i, t: (0, 0)),
                pl.BlockSpec((f_pad, d_pad), lambda i, t: (0, 0)),
                pl.BlockSpec((1, d_pad), lambda i, t: (0, 0)),
                pl.BlockSpec((f_pad, k_pad), lambda i, t: (0, 0)),
                pl.BlockSpec((1, k_pad), lambda i, t: (0, 0)),
            ],
            out_specs=[pl.BlockSpec((None, 1, d_pad), lambda i, t: (i, 0, 0)),
                       pl.BlockSpec((None, 1, k_pad), lambda i, t: (i, 0, 0))],
            scratch_shapes=[pltpu.VMEM((1, f_pad), jnp.float32)],
        ),
        compiler_params=pltpu.CompilerParams(
            dimension_semantics=("parallel", "arbitrary"),
            vmem_limit_bytes=32 * 1024 * 1024),
        cost_estimate=cost,
    )(x_pad, w_conv, params["b_conv"], params["w_feat"], params["b_feat"],
      params["w_logits"], params["b_logits"])

    # Strip lane padding (padded lanes are exactly zero by construction).
    return feat_pad[:, 0, :feat_dim], logit_pad[:, 0, :class_num]


# ---------------------------------------------------------------------------
# Deterministic synthetic parameters (padded, lane-dense, folded layouts)
# ---------------------------------------------------------------------------
def init_params(key, in_channels=3, conv_filters=16, feat_dim=32, class_num=8):
    c_pad = _round_up(in_channels, 8)
    k_conv = _round_up(9 * c_pad, 128)
    f_pad = _round_up(conv_filters, 128)
    d_pad = _round_up(feat_dim, 128)
    k_pad = _round_up(class_num, 128)

    ks = jax.random.split(key, 8)
    w_conv = jax.random.normal(ks[0], (9, in_channels, conv_filters),
                               jnp.float32) * 0.1
    b_conv = jax.random.normal(ks[1], (conv_filters,), jnp.float32) * 0.01
    w_bott = jax.random.normal(ks[2], (conv_filters, feat_dim), jnp.float32) * 0.1
    b_bott = jax.random.normal(ks[3], (feat_dim,), jnp.float32) * 0.01

    # Inference-mode BatchNorm1d folded into an affine scale/shift.
    gamma = 1.0 + 0.1 * jax.random.normal(ks[4], (feat_dim,), jnp.float32)
    beta = 0.1 * jax.random.normal(ks[5], (feat_dim,), jnp.float32)
    run_mean = 0.05 * jax.random.normal(ks[6], (feat_dim,), jnp.float32)
    run_var = jnp.ones((feat_dim,), jnp.float32)
    eps = 1e-5
    bn_scale = gamma / jnp.sqrt(run_var + eps)
    bn_shift = beta - run_mean * bn_scale

    # Fold BN into the bottleneck:  feat = pooled @ w_feat + b_feat
    w_feat = w_bott * bn_scale[None, :]
    b_feat = b_bott * bn_scale + bn_shift

    # Weight-normalized classifier: w = g * v / ||v|| (row-wise).
    v = jax.random.normal(ks[7], (class_num, feat_dim), jnp.float32)
    g = jnp.ones((class_num, 1), jnp.float32)
    w_cls = (g * v / (jnp.linalg.norm(v, axis=1, keepdims=True) + 1e-12)).T

    # Fused classifier path:  logits = pooled @ w_logits + b_logits
    # (mathematically identical to feat @ w_cls).
    w_logits = w_feat @ w_cls
    b_logits = b_feat @ w_cls

    def pad2(a, rows, cols, dtype):
        out = jnp.zeros((rows, cols), jnp.float32)
        return out.at[:a.shape[0], :a.shape[1]].set(a).astype(dtype)

    # Conv weights: tap-major / channel-minor rows, K zero-padded to 128.
    w_conv_pad = jnp.zeros((9, c_pad, conv_filters), jnp.float32)
    w_conv_pad = w_conv_pad.at[:, :in_channels, :].set(w_conv)
    w_conv_flat = w_conv_pad.reshape(9 * c_pad, conv_filters)

    return {
        "w_conv": pad2(w_conv_flat, k_conv, f_pad, jnp.bfloat16),
        "b_conv": pad2(b_conv[None, :], 1, f_pad, jnp.float32),
        "w_feat": pad2(w_feat, f_pad, d_pad, jnp.bfloat16),
        "b_feat": pad2(b_feat[None, :], 1, d_pad, jnp.float32),
        "w_logits": pad2(w_logits, f_pad, k_pad, jnp.bfloat16),
        "b_logits": pad2(b_logits[None, :], 1, k_pad, jnp.float32),
    }


# ---------------------------------------------------------------------------
# Pure-JAX reference (same padded / bf16-rounded params), for correctness
# ---------------------------------------------------------------------------
@functools.partial(jax.jit, static_argnames=("feat_dim", "class_num"))
def reference_forward(x_nchw, params, *, feat_dim, class_num):
    n, c, h, w = x_nchw.shape
    f_pad = params["w_conv"].shape[1]
    c_pad = _round_up(c, 8)

    x_nhwc = jnp.transpose(x_nchw, (0, 2, 3, 1)).astype(jnp.bfloat16)
    x_pad = jnp.pad(x_nhwc, ((0, 0), (1, 1), (1, 1), (0, c_pad - c)))
    x_pad = x_pad.astype(jnp.float32)

    w9 = params["w_conv"][:9 * c_pad].astype(jnp.float32).reshape(9, c_pad, f_pad)
    conv = jnp.zeros((n, h, w, f_pad), jnp.float32)
    for di in range(3):
        for dj in range(3):
            conv = conv + jnp.einsum("nhwc,cf->nhwf",
                                     x_pad[:, di:di + h, dj:dj + w, :],
                                     w9[di * 3 + dj])
    conv = jnp.maximum(conv + params["b_conv"][0], 0.0)
    pooled = jnp.mean(conv, axis=(1, 2))
    pooled = pooled.astype(jnp.bfloat16).astype(jnp.float32)

    feat = pooled @ params["w_feat"].astype(jnp.float32) + params["b_feat"][0]
    logits = pooled @ params["w_logits"].astype(jnp.float32) + params["b_logits"][0]
    return feat[:, :feat_dim], logits[:, :class_num]


if __name__ == "__main__":
    key = jax.random.PRNGKey(0)
    k_param, k_x = jax.random.split(key)

    N, C, H, W = 2, 3, 16, 16
    FEAT_DIM, CLASS_NUM = 32, 8

    x = jax.random.normal(k_x, (N, C, H, W), jnp.float32)
    params = init_params(k_param, in_channels=C, conv_filters=16,
                         feat_dim=FEAT_DIM, class_num=CLASS_NUM)

    features, logits = guiding_pseudo_sfda_forward(
        x, params, feat_dim=FEAT_DIM, class_num=CLASS_NUM)
    jax.block_until_ready((features, logits))

    assert features.shape == (N, FEAT_DIM)
    assert logits.shape == (N, CLASS_NUM)

    ref_feat, ref_logits = reference_forward(
        x, params, feat_dim=FEAT_DIM, class_num=CLASS_NUM)
    assert bool(jnp.allclose(features, ref_feat, rtol=2e-2, atol=2e-3)), \
        "features mismatch vs reference"
    assert bool(jnp.allclose(logits, ref_logits, rtol=2e-2, atol=2e-3)), \
        "logits mismatch vs reference"

    print("KERNEL_OK")
</pallas_src>

<mosaic_0001>
module attributes {stable_mosaic.version = 11 : i64} {
  func.func @conv_pool_head_kernel(%arg0: i32, %arg1: i32, %arg2: memref<1x18x18x8xbf16, #tpu.memory_space<vmem>>, %arg3: memref<128x128xbf16, #tpu.memory_space<vmem>>, %arg4: memref<1x128xf32, #tpu.memory_space<vmem>>, %arg5: memref<128x128xbf16, #tpu.memory_space<vmem>>, %arg6: memref<1x128xf32, #tpu.memory_space<vmem>>, %arg7: memref<128x128xbf16, #tpu.memory_space<vmem>>, %arg8: memref<1x128xf32, #tpu.memory_space<vmem>>, %arg9: memref<1x1x128xf32, #tpu.memory_space<vmem>>, %arg10: memref<1x1x128xf32, #tpu.memory_space<vmem>>, %arg11: memref<1x128xf32, #tpu.memory_space<vmem>>) attributes {dimension_semantics = [#tpu.dimension_semantics<parallel>, #tpu.dimension_semantics<arbitrary>], iteration_bounds = array<i64: 2, 1>, scalar_prefetch = 0 : i64, scratch_operands = 1 : i64, tpu.core_type = #tpu.core_type<tc>, window_params = [{transform_indices = @transform_0, window_bounds = array<i64: 1, 18, 18, 8>}, {pipeline_mode = #tpu.pipeline_mode<synchronous>, transform_indices = @transform_1, window_bounds = array<i64: 128, 128>}, {pipeline_mode = #tpu.pipeline_mode<synchronous>, transform_indices = @transform_2, window_bounds = array<i64: 1, 128>}, {pipeline_mode = #tpu.pipeline_mode<synchronous>, transform_indices = @transform_3, window_bounds = array<i64: 128, 128>}, {pipeline_mode = #tpu.pipeline_mode<synchronous>, transform_indices = @transform_4, window_bounds = array<i64: 1, 128>}, {pipeline_mode = #tpu.pipeline_mode<synchronous>, transform_indices = @transform_5, window_bounds = array<i64: 128, 128>}, {pipeline_mode = #tpu.pipeline_mode<synchronous>, transform_indices = @transform_6, window_bounds = array<i64: 1, 128>}, {transform_indices = @transform_7, window_bounds = array<i64: 1, 1, 128>}, {transform_indices = @transform_8, window_bounds = array<i64: 1, 1, 128>}]} {
    %c0_i32 = arith.constant 0 : i32
    %0 = arith.cmpi eq, %arg1, %c0_i32 : i32
    %1 = arith.extui %0 : i1 to i32
    %c0_i32_0 = arith.constant 0 : i32
    %2 = arith.cmpi ne, %1, %c0_i32_0 : i32
    scf.if %2 {
      %cst_16 = arith.constant 0.000000e+00 : f32
      %35 = vector.broadcast %cst_16 : f32 to vector<1x128xf32>
      %c0_17 = arith.constant 0 : index
      %c0_18 = arith.constant 0 : index
      %36 = vector.load %arg11[%c0_17, %c0_18] : memref<1x128xf32, #tpu.memory_space<vmem>>, vector<1x128xf32>
      tpu.vector_store %arg11[%c0_17, %c0_18], %35 {strides = array<i32>} : memref<1x128xf32, #tpu.memory_space<vmem>>, vector<1x128xf32>,
    } else {
    }
    %c16_i32 = arith.constant 16 : i32
    %3 = arith.muli %arg1, %c16_i32 : i32
    %4 = tpu.assume_multiple %3, 16 : i32
    %c0 = arith.constant 0 : index
    %5 = arith.index_cast %4 : i32 to index
    %c0_1 = arith.constant 0 : index
    %c0_2 = arith.constant 0 : index
    %6 = vector.load %arg2[%c0, %5, %c0_1, %c0_2] : memref<1x18x18x8xbf16, #tpu.memory_space<vmem>>, vector<1x18x18x8xbf16>
    %7 = vector.shape_cast %6 : vector<1x18x18x8xbf16> to vector<18x18x8xbf16>
    %8 = vector.extract_strided_slice %7 {offsets = [0, 0, 0], sizes = [16, 16, 8], strides = [1, 1, 1]} : vector<18x18x8xbf16> to vector<16x16x8xbf16>
    %9 = vector.extract_strided_slice %7 {offsets = [0, 1, 0], sizes = [16, 16, 8], strides = [1, 1, 1]} : vector<18x18x8xbf16> to vector<16x16x8xbf16>
    %10 = vector.extract_strided_slice %7 {offsets = [0, 2, 0], sizes = [16, 16, 8], strides = [1, 1, 1]} : vector<18x18x8xbf16> to vector<16x16x8xbf16>
    %11 = vector.extract_strided_slice %7 {offsets = [1, 0, 0], sizes = [16, 16, 8], strides = [1, 1, 1]} : vector<18x18x8xbf16> to vector<16x16x8xbf16>
    %12 = vector.extract_strided_slice %7 {offsets = [1, 1, 0], sizes = [16, 16, 8], strides = [1, 1, 1]} : vector<18x18x8xbf16> to vector<16x16x8xbf16>
    %13 = vector.extract_strided_slice %7 {offsets = [1, 2, 0], sizes = [16, 16, 8], strides = [1, 1, 1]} : vector<18x18x8xbf16> to vector<16x16x8xbf16>
    %14 = vector.extract_strided_slice %7 {offsets = [2, 0, 0], sizes = [16, 16, 8], strides = [1, 1, 1]} : vector<18x18x8xbf16> to vector<16x16x8xbf16>
    %15 = vector.extract_strided_slice %7 {offsets = [2, 1, 0], sizes = [16, 16, 8], strides = [1, 1, 1]} : vector<18x18x8xbf16> to vector<16x16x8xbf16>
    %16 = vector.extract_strided_slice %7 {offsets = [2, 2, 0], sizes = [16, 16, 8], strides = [1, 1, 1]} : vector<18x18x8xbf16> to vector<16x16x8xbf16>
    %cst = arith.constant 0.000000e+00 : bf16
    %17 = vector.broadcast %cst : bf16 to vector<16x16x56xbf16>
    %18 = tpu.concatenate %8, %9, %10, %11, %12, %13, %14, %15, %16, %17 in 2 : vector<16x16x8xbf16>, vector<16x16x8xbf16>, vector<16x16x8xbf16>, vector<16x16x8xbf16>, vector<16x16x8xbf16>, vector<16x16x8xbf16>, vector<16x16x8xbf16>, vector<16x16x8xbf16>, vector<16x16x8xbf16>, vector<16x16x56xbf16> -> vector<16x16x128xbf16>
    %19 = vector.shape_cast %18 : vector<16x16x128xbf16> to vector<256x128xbf16>
    %c0_3 = arith.constant 0 : index
    %c0_4 = arith.constant 0 : index
    %20 = vector.load %arg3[%c0_3, %c0_4] : memref<128x128xbf16, #tpu.memory_space<vmem>>, vector<128x128xbf16>
    %cst_5 = arith.constant dense<0.000000e+00> : vector<256x128xf32>
    %21 = tpu.matmul %19, %20, %cst_5 {dimension_numbers = #tpu.dot_dimension_numbers<[1], [0], [0], [1], [0, 0, 1, 1], [], []>} : vector<256x128xbf16>, vector<128x128xbf16>, vector<256x128xf32> -> vector<256x128xf32>
    %c0_6 = arith.constant 0 : index
    %c0_7 = arith.constant 0 : index
    %22 = vector.load %arg4[%c0_6, %c0_7] : memref<1x128xf32, #tpu.memory_space<vmem>>, vector<1x128xf32>
    %23 = vector.broadcast %22 : vector<1x128xf32> to vector<256x128xf32>
    %24 = arith.addf %21, %23 : vector<256x128xf32>
    %cst_8 = arith.constant 0.000000e+00 : f32
    %25 = vector.broadcast %cst_8 : f32 to vector<256x128xf32>
    %26 = arith.maximumf %24, %25 : vector<256x128xf32>
    %c0_9 = arith.constant 0 : index
    %c0_10 = arith.constant 0 : index
    %27 = vector.load %arg11[%c0_9, %c0_10] : memref<1x128xf32, #tpu.memory_space<vmem>>, vector<1x128xf32>
    %cst_11 = arith.constant dense<0.000000e+00> : vector<128xf32>
    %28 = vector.multi_reduction <add>, %26, %cst_11 [0] : vector<256x128xf32> to vector<128xf32>
    %29 = vector.shape_cast %28 : vector<128xf32> to vector<1x128xf32>
    %30 = arith.addf %27, %29 : vector<1x128xf32>
    %c0_12 = arith.constant 0 : index
    %c0_13 = arith.constant 0 : index
    %31 = vector.load %arg11[%c0_12, %c0_13] : memref<1x128xf32, #tpu.memory_space<vmem>>, vector<1x128xf32>
    tpu.vector_store %arg11[%c0_12, %c0_13], %30 {strides = array<i32>} : memref<1x128xf32, #tpu.memory_space<vmem>>, vector<1x128xf32>,
    %c0_i32_14 = arith.constant 0 : i32
    %32 = arith.cmpi eq, %arg1, %c0_i32_14 : i32
    %33 = arith.extui %32 : i1 to i32
    %c0_i32_15 = arith.constant 0 : i32
    %34 = arith.cmpi ne, %33, %c0_i32_15 : i32
    scf.if %34 {
      %c0_16 = arith.constant 0 : index
      %c0_17 = arith.constant 0 : index
      %35 = vector.load %arg11[%c0_16, %c0_17] : memref<1x128xf32, #tpu.memory_space<vmem>>, vector<1x128xf32>
      %cst_18 = arith.constant 3.906250e-03 : f32
      %36 = vector.broadcast %cst_18 : f32 to vector<1x128xf32>
      %37 = arith.mulf %35, %36 : vector<1x128xf32>
      %38 = arith.truncf %37 : vector<1x128xf32> to vector<1x128xbf16>
      %c0_19 = arith.constant 0 : index
      %c0_20 = arith.constant 0 : index
      %39 = vector.load %arg5[%c0_19, %c0_20] : memref<128x128xbf16, #tpu.memory_space<vmem>>, vector<128x128xbf16>
      %cst_21 = arith.constant dense<0.000000e+00> : vector<1x128xf32>
      %40 = tpu.matmul %38, %39, %cst_21 {dimension_numbers = #tpu.dot_dimension_numbers<[1], [0], [0], [1], [0, 0, 1, 1], [], []>} : vector<1x128xbf16>, vector<128x128xbf16>, vector<1x128xf32> -> vector<1x128xf32>
      %c0_22 = arith.constant 0 : index
      %c0_23 = arith.constant 0 : index
      %41 = vector.load %arg6[%c0_22, %c0_23] : memref<1x128xf32, #tpu.memory_space<vmem>>, vector<1x128xf32>
      %42 = arith.addf %40, %41 : vector<1x128xf32>
      %c0_24 = arith.constant 0 : index
      %c0_25 = arith.constant 0 : index
      %c0_26 = arith.constant 0 : index
      %43 = vector.load %arg9[%c0_24, %c0_25, %c0_26] : memref<1x1x128xf32, #tpu.memory_space<vmem>>, vector<1x1x128xf32>
      %44 = vector.shape_cast %43 : vector<1x1x128xf32> to vector<1x128xf32>
      %45 = vector.shape_cast %42 : vector<1x128xf32> to vector<1x1x128xf32>
      tpu.vector_store %arg9[%c0_24, %c0_25, %c0_26], %45 {strides = array<i32>} : memref<1x1x128xf32, #tpu.memory_space<vmem>>, vector<1x1x128xf32>,
      %c0_27 = arith.constant 0 : index
      %c0_28 = arith.constant 0 : index
      %46 = vector.load %arg7[%c0_27, %c0_28] : memref<128x128xbf16, #tpu.memory_space<vmem>>, vector<128x128xbf16>
      %cst_29 = arith.constant dense<0.000000e+00> : vector<1x128xf32>
      %47 = tpu.matmul %38, %46, %cst_29 {dimension_numbers = #tpu.dot_dimension_numbers<[1], [0], [0], [1], [0, 0, 1, 1], [], []>} : vector<1x128xbf16>, vector<128x128xbf16>, vector<1x128xf32> -> vector<1x128xf32>
      %c0_30 = arith.constant 0 : index
      %c0_31 = arith.constant 0 : index
      %48 = vector.load %arg8[%c0_30, %c0_31] : memref<1x128xf32, #tpu.memory_space<vmem>>, vector<1x128xf32>
      %49 = arith.addf %47, %48 : vector<1x128xf32>
      %c0_32 = arith.constant 0 : index
      %c0_33 = arith.constant 0 : index
      %c0_34 = arith.constant 0 : index
      %50 = vector.load %arg10[%c0_32, %c0_33, %c0_34] : memref<1x1x128xf32, #tpu.memory_space<vmem>>, vector<1x1x128xf32>
      %51 = vector.shape_cast %50 : vector<1x1x128xf32> to vector<1x128xf32>
      %52 = vector.shape_cast %49 : vector<1x128xf32> to vector<1x1x128xf32>
      tpu.vector_store %arg10[%c0_32, %c0_33, %c0_34], %52 {strides = array<i32>} : memref<1x1x128xf32, #tpu.memory_space<vmem>>, vector<1x1x128xf32>,
    } else {
    }
    return
  }
  func.func @transform_0(%arg0: i32, %arg1: i32) -> (i32, i32, i32, i32) {
    %c0_i32 = arith.constant 0 : i32
    %c0_i32_0 = arith.constant 0 : i32
    %c0_i32_1 = arith.constant 0 : i32
    %c0_i32_2 = arith.constant 0 : i32
    return %arg0, %c0_i32, %c0_i32_0, %c0_i32_1 : i32, i32, i32, i32
  }
  func.func @transform_1(%arg0: i32, %arg1: i32) -> (i32, i32) {
    %c0_i32 = arith.constant 0 : i32
    %c0_i32_0 = arith.constant 0 : i32
    %c0_i32_1 = arith.constant 0 : i32
    return %c0_i32, %c0_i32_0 : i32, i32
  }
  func.func @transform_2(%arg0: i32, %arg1: i32) -> (i32, i32) {
    %c0_i32 = arith.constant 0 : i32
    %c0_i32_0 = arith.constant 0 : i32
    %c0_i32_1 = arith.constant 0 : i32
    return %c0_i32, %c0_i32_0 : i32, i32
  }
  func.func @transform_3(%arg0: i32, %arg1: i32) -> (i32, i32) {
    %c0_i32 = arith.constant 0 : i32
    %c0_i32_0 = arith.constant 0 : i32
    %c0_i32_1 = arith.constant 0 : i32
    return %c0_i32, %c0_i32_0 : i32, i32
  }
  func.func @transform_4(%arg0: i32, %arg1: i32) -> (i32, i32) {
    %c0_i32 = arith.constant 0 : i32
    %c0_i32_0 = arith.constant 0 : i32
    %c0_i32_1 = arith.constant 0 : i32
    return %c0_i32, %c0_i32_0 : i32, i32
  }
  func.func @transform_5(%arg0: i32, %arg1: i32) -> (i32, i32) {
    %c0_i32 = arith.constant 0 : i32
    %c0_i32_0 = arith.constant 0 : i32
    %c0_i32_1 = arith.constant 0 : i32
    return %c0_i32, %c0_i32_0 : i32, i32
  }
  func.func @transform_6(%arg0: i32, %arg1: i32) -> (i32, i32) {
    %c0_i32 = arith.constant 0 : i32
    %c0_i32_0 = arith.constant 0 : i32
    %c0_i32_1 = arith.constant 0 : i32
    return %c0_i32, %c0_i32_0 : i32, i32
  }
  func.func @transform_7(%arg0: i32, %arg1: i32) -> (i32, i32, i32) {
    %c0_i32 = arith.constant 0 : i32
    %c0_i32_0 = arith.constant 0 : i32
    %c0_i32_1 = arith.constant 0 : i32
    return %arg0, %c0_i32, %c0_i32_0 : i32, i32, i32
  }
  func.func @transform_8(%arg0: i32, %arg1: i32) -> (i32, i32, i32) {
    %c0_i32 = arith.constant 0 : i32
    %c0_i32_0 = arith.constant 0 : i32
    %c0_i32_1 = arith.constant 0 : i32
    return %arg0, %c0_i32, %c0_i32_0 : i32, i32, i32
  }
}

</mosaic_0001>

<bundles_post_ra>
// kernel: guiding_pseudo_sfda_forward.1
= control target key start
LH: loop header
LB: loop body
LE: loop exit
PB: predicated region body
PF: predicated region fallthrough
CT: control target
= control target key end

     0   :  { %s3277_s0 = inlined_call_operand.vmem [shape: bf16[2,18,18,8], index: 0, kind: input, shape index: {}]   ;;  %s3278_s1 = inlined_call_operand.vmem [shape: bf16[128,128], index: 1, kind: input, shape index: {}]   ;;  %s3279_s2 = inlined_call_operand.vmem [shape: f32[1,128], index: 2, kind: input, shape index: {}]   ;;  %s3280_s3 = inlined_call_operand.vmem [shape: bf16[128,128], index: 3, kind: input, shape index: {}]   ;;  %s3281_s4 = inlined_call_operand.vmem [shape: f32[1,128], index: 4, kind: input, shape index: {}]   ;;  %s3282_s5 = inlined_call_operand.vmem [shape: bf16[128,128], index: 5, kind: input, shape index: {}]   ;;  %s3283_s6 = inlined_call_operand.vmem [shape: f32[1,128], index: 6, kind: input, shape index: {}]   ;;  %s3284_s7 = inlined_call_operand.hbm [shape: f32[2,1,128], index: 7, kind: output, shape index: {0}]   ;;  %s3285_s8 = inlined_call_operand.hbm [shape: f32[2,1,128], index: 8, kind: output, shape index: {1}]  }
   0x1   :  { %3288 = sst [smem:[#allocation9_spill]] %s3277_s0 }
   0x2   :  { %3289 = sst [smem:[#allocation10_spill]] %s3278_s1 }
   0x3   :  { %3290 = sst [smem:[#allocation11_spill]] %s3279_s2 }
   0x4   :  { %3291 = sst [smem:[#allocation12_spill]] %s3280_s3 }
   0x5   :  { %14 = vsyncpa [#allocation4], 0 }
   0x6   :  { %16 = vsyncpa [#allocation4 + $0x1], 0 }
   0x7   :  { %17 = vsyncpa [#allocation6], 0 }
   0x8   :  { %19 = vsyncpa [#allocation6 + $0x1], 0  ;;  %s2370_s27 = smov 0   ;;  %s2372_s28 = smov 0  }
   0x9   :  { %s2374_s29 = smov 0   ;;  %s2376_s30 = smov 0  }
   0xa   :  { %s2378_s9 = smov 0   ;;  %s2380_s10 = smov 0  }
   0xb LB: > { %s1875_s11 = sadd.s32 4294967295, %s2314_s10   ;;  %s1876_s12 = sadd.s32 4294967294, %s2314_s10   ;;  %s2314_s10 = sphi %s2380_s10, %s25_s10   ;;  %s2310_s9 = sphi %s2378_s9, %s3303_s9   ;;  %s2306_s30 = sphi %s2376_s30, %s3302_s30   ;;  %s2302_s29 = sphi %s2374_s29, %s3301_s29   ;;  %s2298_s28 = sphi %s2372_s28, %s3300_s28   ;;  %s2294_s27 = sphi %s2370_s27, %s3299_s27  }
   0xc   : > { %s37_s13 = sadd.s32 1, %s2310_s9  ;;  %s196_s14 = sadd.s32 1, %s2302_s29 }
   0xd   : > { %p39_p0 = scmp.ge.s32.totalorder %s37_s13, 2  ;;  %p206_p1 = scmp.ne.s32.totalorder %s2302_s29, %s2298_s28 }
   0xe   : > { %p207_p2 = scmp.eq.s32.totalorder %s1875_s11, 1  ;;  %p212_p3 = scmp.ne.s32.totalorder %s2298_s28, %s2294_s27 }
   0xf   : > { %s3305_s13 = smov (%p39_p0, %s37_s13), 0  ;;  %p213_p5 = scmp.eq.s32.totalorder %s1876_s12, 1 }
  0x10   : > { %p2410_p4 = por %p207_p2, %p206_p1  ;;  %s193_s16 = ssub.s32 %s2310_s9, %s3305_s13 }
  0x11   : > { %p1879_p6 = scmp.ge.s32.totalorder %s2314_s10, 1  ;;  %p194_p7 = scmp.eq.s32.totalorder %s193_s16, 0 }
  0x12   : > { %p2417_p8 = por %p213_p5, %p212_p3  ;;  %p283_p9 = scmp.lt.s32.totalorder %s2314_s10, 3 }
  0x13   : > { %s2423_s18 = scalar_select %p194_p7, %s2302_s29, %s196_s14  }
  0x14   : > { %p284_p10 = pnand %p1879_p6, %p283_p9 }
  0x15   : > { %p320_p11 = scmp.lt.s32.totalorder (!%p284_p10), %s2306_s30, 1  ;;  %s3294_s0 = sld [smem:[#allocation9_spill]] (!%p284_p10) }
  0x16   : > { %287 = sbr.rel (%p284_p10) target bundleno = 815 (0x32f), region = 48  ;;  %s3286_s24 = smov (!%p284_p10), 24  }
  0x17   : > { %s2317_s25 = smov (!%p284_p10), 48   ;;  %s2318_s26 = smov (!%p284_p10), 16  }
  0x18   : > { %s2319_s11 = smov (!%p284_p10), 64   ;;  %s2320_s12 = smov (!%p284_p10), 40  }
  0x19   : > { %s2321_s14 = smov (!%p284_p10), 8   ;;  %s2322_s16 = smov (!%p284_p10), 32  }
  0x1a   : > { %s3295_s1 = sld [smem:[#allocation10_spill]] (!%p284_p10)  ;;  %s3209_s21 = sand.u32 (!%p284_p10), 1, %s2298_s28  }
  0x1b   : > { %s321_s19 = scalar_select %p320_p11, %s2306_s30, 1  ;;  %vm742_vm0 = vcmask 1046528   ;;  %vm517_vm1 = vsmask.f32 7424  ;;  %vm1061_vm2 = vcmask 64512   ;;  %vm1094_vm3 = vcmask 130048  }
  0x1c   : > { %vm1127_vm4 = vcmask 195584   ;;  %vm1160_vm5 = vcmask 261120   ;;  %vm1193_vm6 = vcmask 326656   ;;  %vm1226_vm7 = vcmask 392192   ;;  %s3297_s2 = sld [smem:[#allocation11_spill]] }
  0x1d   : > { %s2133_s20 = smul.u32 216, %s321_s19  ;;  %s2323_s19 = smov 56   ;;  %vm1259_vm8 = vcmask 457728   ;;  %vm1292_vm9 = vcmask 523264   ;;  %vm1325_vm10 = vcmask 588800  }
  0x1e   : > { %s3298_s3 = sld [smem:[#allocation12_spill]] }
  0x1f   : > { %s2430_s23 = scalar_lea.vmem %s3294_s0, %s2133_s20  ;;  %s1778_s20 = scalar_lea.hbm %s3285_s8, %s2306_s30 }
  0x20   : > { %v2433_v0 = vld [vmem:[%s2430_s23 + $0xc] sm:$0xff]  ;;  %v2436_v1 = vld [vmem:[%s2430_s23 + $0x18] sm:$0xff]  ;;  %v2439_v2 = vld [vmem:[%s2430_s23] sm:$0xff]  ;;  %s3226_s0 = sshll.u32 %s1778_s20, 4  ;;  %s1783_s0 = int_to_ptr.hbm [resolvable:$true] %s3226_s0 }
  0x21   : > { %v337_v3 = vld [vmem:[%s2430_s23 + $0x8] sm:$0x1]  ;;  %v343_v4 = vld [vmem:[%s2430_s23 + $0x20] sm:$0x1]  ;;  %v340_v5 = vld [vmem:[%s2430_s23 + $0x14] sm:$0x1]  ;;  %828 = vrot.lane.b32.xlu1 %v2433_v0, %s3286_s24 }
  0x22   : > { %947 = vrot.lane.b32.xlu2 %v2436_v1, %s2317_s25  ;;  %v485_v6 = vunpack.c.l.b16 %v337_v3  ;;  %v487_v7 = vunpack.c.l.b16 %v343_v4  ;;  %v743_v8 = vrot.slane %v2439_v2, 1  ;;  %v486_v9 = vunpack.c.l.b16 %v340_v5  ;;  %v346_v34 = vld [vmem:[%s2430_s23 + $0x2c] sm:$0x1]  ;;  %v2467_v40 = vld [vmem:[%s2430_s23 + $0x24] sm:$0xff]  ;;  %v358_v53 = vld [vmem:[%s2430_s23 + $0x5c] sm:$0x1] }
  0x23   : > { %v521_v10 = vshll.u32 %v2439_v2, 16  ;;  %v749_v13 = vrot.slane %v2436_v1, 1  ;;  %v533_v14 = vshll.u32 %v2433_v0, 16  ;;  %v746_v16 = vrot.slane %v2433_v0, 1  ;;  %v2489_v55 = vld [vmem:[%s2430_s23 + $0x54] sm:$0xff] }
  0x24   : > { %v501_v11 = vpack.c.b16 %v485_v6, %v485_v6  ;;  %v503_v12 = vpack.c.b16 %v487_v7, %v487_v7  ;;  %v502_v15 = vpack.c.b16 %v486_v9, %v486_v9  ;;  %v519_v17 = vshrl.u32 %v2439_v2, 16  ;;  %v370_v62 = vld [vmem:[%s2430_s23 + $0x8c] sm:$0x1]  ;;  %v2506_v7 = vld [vmem:[%s2430_s23 + $0x84] sm:$0xff] }
  0x25   : > { %v523_v20 = vrot.slane %v521_v10, 1  ;;  %v531_v23 = vshrl.u32 %v2433_v0, 16  ;;  %v535_v24 = vrot.slane %v533_v14, 1  ;;  %v545_v31 = vshll.u32 %v2436_v1, 16  ;;  %v349_v14 = vld [vmem:[%s2430_s23 + $0x38] sm:$0x1] }
  0x26   : > { %v744_v18 = vrot.slane %v501_v11, 1  ;;  %v750_v19 = vrot.slane %v503_v12, 1  ;;  %v526_v21 = vshll.u32 %v501_v11, 16  ;;  %v747_v22 = vrot.slane %v502_v15, 1 }
  0x27   : > { %v538_v25 = vshll.u32 %v502_v15, 16  ;;  %v524_v29 = vor.u32 %v523_v20, %v519_v17  ;;  %v536_v32 = vor.u32 %v535_v24, %v531_v23  ;;  %v543_v36 = vshrl.u32 %v2436_v1, 16 }
  0x28   : > { %v745_v26 = vsel %vm742_vm0, %v743_v8, %v744_v18  ;;  %v751_v27 = vsel %vm742_vm0, %v749_v13, %v750_v19  ;;  %v748_v28 = vsel %vm742_vm0, %v746_v16, %v747_v22  ;;  %v528_v30 = vrot.slane %v526_v21, 1  ;;  %v361_v13 = vld [vmem:[%s2430_s23 + $0x68] sm:$0x1]  ;;  %v2521_v16 = vld [vmem:[%s2430_s23 + $0x60] sm:$0xff]  ;;  %v2524_v18 = vld [vmem:[%s2430_s23 + $0x30] sm:$0xff] }
  0x29   : > { %791 = vrot.lane.b32.xlu0 %v745_v26, %s2318_s26  ;;  %1029 = vrot.lane.b32.xlu1 %v751_v27, %s2319_s11  ;;  %v540_v33 = vrot.slane %v538_v25, 1  ;;  %v547_v37 = vrot.slane %v545_v31, 1  ;;  %v550_v38 = vshll.u32 %v503_v12, 16  ;;  %v488_v41 = vunpack.c.l.b16 %v346_v34 }
  0x2a   : > { %910 = vrot.lane.b32.xlu2 %v748_v28, %s2320_s12  ;;  %v529_v35 = vsel %vm517_vm1, %v524_v29, %v528_v30  ;;  %v557_v45 = vshll.u32 %v2467_v40, 16  ;;  %v555_v47 = vshrl.u32 %v2467_v40, 16  ;;  %v492_v54 = vunpack.c.l.b16 %v358_v53 }
  0x2b   : > { %v541_v39 = vsel %vm517_vm1, %v536_v32, %v540_v33  ;;  %v548_v42 = vor.u32 %v547_v37, %v543_v36  ;;  %v552_v43 = vrot.slane %v550_v38, 1  ;;  %v504_v44 = vpack.c.b16 %v488_v41, %v488_v41 }
  0x2c   : > { %v559_v48 = vrot.slane %v557_v45, 1  ;;  %v508_v56 = vpack.c.b16 %v492_v54, %v492_v54  ;;  %v752_v57 = vrot.slane %v2467_v40, 1  ;;  %v605_v59 = vshll.u32 %v2489_v55, 16  ;;  %v2552_v45 = vld [vmem:[%s2430_s23 + $0x90] sm:$0xff] }
  0x2d   : > { %v553_v46 = vsel %vm517_vm1, %v548_v42, %v552_v43  ;;  %v562_v49 = vshll.u32 %v504_v44, 16  ;;  %v753_v58 = vrot.slane %v504_v44, 1  ;;  %v764_v60 = vrot.slane %v2489_v55, 1  ;;  %v373_v43 = vld [vmem:[%s2430_s23 + $0x98] sm:$0x1] }
  0x2e   : > { %v560_v50 = vor.u32 %v559_v48, %v555_v47  ;;  %v765_v61 = vrot.slane %v508_v56, 1  ;;  %v603_v3 = vshrl.u32 %v2489_v55, 16  ;;  %v607_v4 = vrot.slane %v605_v59, 1 }
  0x2f   : > { %v564_v51 = vrot.slane %v562_v49, 1  ;;  %v2499_v63 = vsel %vm742_vm0, %v752_v57, %v753_v58  ;;  %v610_v5 = vshll.u32 %v508_v56, 16  ;;  %v496_v8 = vunpack.c.l.b16 %v370_v62  ;;  %v364_v49 = vld [vmem:[%s2430_s23 + $0x74] sm:$0x1]  ;;  %v2092_v56 = vld [vmem:[%s3295_s1 + $0x38] sm:$0xff]  ;;  %v2580_v62 = vld [vmem:[%s2430_s23 + $0x6c] sm:$0xff] }
  0x30   : > { %v2503_v6 = vsel %vm742_vm0, %v764_v60, %v765_v61  ;;  %v608_v9 = vor.u32 %v607_v4, %v603_v3  ;;  %v653_v12 = vshll.u32 %v2506_v7, 16  ;;  %v493_v17 = vunpack.c.l.b16 %v361_v13  ;;  %v376_v60 = vld [vmem:[%s2430_s23 + $0xa4] sm:$0x1]  ;;  %1427 = vmatpush.bf16.msra.mxu0 %v2092_v56  ;;  %2110 = vmatpush.bf16.msra.mxu2 %v2092_v56 }
  0x31   : > { %710 = vrot.lane.b32.xlu0 %v529_v35, %s2321_s14  ;;  %875 = vrot.lane.b32.xlu1 %v541_v39, %s2322_s16  ;;  %v2480_v52 = vsel %vm517_vm1, %v560_v50, %v564_v51  ;;  %v612_v10 = vrot.slane %v610_v5, 1  ;;  %v512_v11 = vpack.c.b16 %v496_v8, %v496_v8  ;;  %v651_v19 = vshrl.u32 %v2506_v7, 16 }
  0x32   : > { %712 = vrot.lane.b32.xlu2 %v541_v39, %s2321_s14  ;;  %v655_v20 = vrot.slane %v653_v12, 1  ;;  %v489_v22 = vunpack.c.l.b16 %v349_v14  ;;  %v509_v23 = vpack.c.b16 %v493_v17, %v493_v17  ;;  %v617_v24 = vshll.u32 %v2521_v16, 16  ;;  %2111 = vmatpush.bf16.msra.mxu3 %v2092_v56  ;;  %v2091_v12 = vld [vmem:[%s3295_s1 + $0x30] sm:$0xff] }
  0x33   : > { %v2518_v15 = vsel %vm517_vm1, %v608_v9, %v612_v10  ;;  %v658_v21 = vshll.u32 %v512_v11, 16  ;;  %v615_v29 = vshrl.u32 %v2521_v16, 16  ;;  %v567_v33 = vshrl.u32 %v2524_v18, 16  ;;  %2109 = vmatpush.bf16.msra.mxu1 %v2092_v56  ;;  %v2588_v10 = vld [vmem:[%s2430_s23 + $0x9c] sm:$0xff] }
  0x34   : > { %v656_v25 = vor.u32 %v655_v20, %v651_v19  ;;  %v619_v30 = vrot.slane %v617_v24, 1  ;;  %v622_v31 = vshll.u32 %v509_v23, 16  ;;  %v776_v41 = vrot.slane %v2506_v7, 1  ;;  %1428 = vmatpush.bf16.msra.mxu0 %v2091_v12  ;;  %2113 = vmatpush.bf16.msra.mxu2 %v2091_v12 }
  0x35   : > { %v660_v26 = vrot.slane %v658_v21, 1  ;;  %v777_v42 = vrot.slane %v512_v11, 1  ;;  %v767_v50 = vrot.slane %v2521_v16, 1  ;;  %v768_v51 = vrot.slane %v509_v23, 1  ;;  %v2090_v23 = vld [vmem:[%s3295_s1 + $0x28] sm:$0xff] }
  0x36   : > { %v620_v36 = vor.u32 %v619_v30, %v615_v29  ;;  %v624_v37 = vrot.slane %v622_v31, 1  ;;  %v665_v54 = vshll.u32 %v2552_v45, 16  ;;  %v755_v57 = vrot.slane %v2524_v18, 1  ;;  %2114 = vmatpush.bf16.msra.mxu3 %v2091_v12 }
  0x37   : > { %v2537_v32 = vsel %vm517_vm1, %v656_v25, %v660_v26  ;;  %v2558_v48 = vsel %vm742_vm0, %v776_v41, %v777_v42  ;;  %v494_v59 = vunpack.c.l.b16 %v364_v49  ;;  %v2577_v61 = vsel %vm742_vm0, %v767_v50, %v768_v51  ;;  %2112 = vmatpush.bf16.msra.mxu1 %v2091_v12  ;;  %v2086_v51 = vld [vmem:[%s3295_s1 + $0x8] sm:$0xff] }
  0x38   : > { %v2549_v44 = vsel %vm517_vm1, %v620_v36, %v624_v37  ;;  %v663_v3 = vshrl.u32 %v2552_v45, 16  ;;  %v667_v4 = vrot.slane %v665_v54, 1  ;;  %v498_v11 = vunpack.c.l.b16 %v376_v60  ;;  %1429 = vmatpush.bf16.msra.mxu0 %v2090_v23  ;;  %2116 = vmatpush.bf16.msra.mxu2 %v2090_v23  ;;  %v352_v60 = vld [vmem:[%s2430_s23 + $0x44] sm:$0x1] }
  0x39   : > { %994 = vrot.lane.b32.xlu0 %v553_v46, %s2323_s19  ;;  %830 = vrot.lane.b32.xlu1 %v2436_v1, %s3286_s24  ;;  %v510_v9 = vpack.c.b16 %v494_v59, %v494_v59  ;;  %v629_v17 = vshll.u32 %v2580_v62, 16  ;;  %v770_v19 = vrot.slane %v2580_v62, 1  ;;  %v627_v25 = vshrl.u32 %v2580_v62, 16 }
  0x3a   : > { %877 = vrot.lane.b32.xlu2 %v553_v46, %s2322_s16  ;;  %v668_v13 = vor.u32 %v667_v4, %v663_v3  ;;  %v2601_v21 = vpack.c.b16 %v498_v11, %v498_v11  ;;  %v675_v29 = vshrl.u32 %v2588_v10, 16  ;;  %2117 = vmatpush.bf16.msra.mxu3 %v2090_v23  ;;  %v782_v56 = vrot.slane %v2588_v10, 1  ;;  %v2679_v3 = vld [vmem:[%s2430_s23 + $0x3c] sm:$0xff] }
  0x3b   : > { %v771_v20 = vrot.slane %v510_v9, 1  ;;  %v631_v26 = vrot.slane %v629_v17, 1  ;;  %2115 = vmatpush.bf16.msra.mxu1 %v2090_v23  ;;  %v490_v4 = vunpack.c.l.b16 %v352_v60  ;;  %v581_v11 = vshll.u32 %v2679_v3, 16 }
  0x3c   : > { %v682_v31 = vshll.u32 %v2601_v21, 16 }
  0x3d   : > { %v583_v17 = vrot.slane %v581_v11, 1 }
  0x3e   : > { %v684_v37 = vrot.slane %v682_v31, 1 }
  0x41   : > { %793 = vrot.lane.b32.xlu0 %v748_v28, %s2318_s26  ;;  %949 = vrot.lane.b32.xlu1 %v2467_v40, %s2317_s25  ;;  %v569_v28 = vshll.u32 %v2524_v18, 16 }
  0x42   : > { %996 = vrot.lane.b32.xlu2 %v2480_v52, %s2323_s19 }
  0x43   : > { %v571_v34 = vrot.slane %v569_v28, 1  ;;  %v2612_v28 = vsel %vm742_vm0, %v770_v19, %v771_v20 }
  0x45   : > { %v572_v38 = vor.u32 %v571_v34, %v567_v33  ;;  %v2089_v33 = vld [vmem:[%s3295_s1 + $0x20] sm:$0xff]  ;;  %v632_v34 = vor.u32 %v631_v26, %v627_v25 }
  0x46   : > { %1430 = vmatpush.bf16.msra.mxu0 %v2089_v33  ;;  %2119 = vmatpush.bf16.msra.mxu2 %v2089_v33 }
  0x47   : > { %2120 = vmatpush.bf16.msra.mxu3 %v2089_v33  ;;  %2118 = vmatpush.bf16.msra.mxu1 %v2089_v33 }
  0x49   : > { %912 = vrot.lane.b32.xlu0 %v751_v27, %s2320_s12  ;;  %714 = vrot.lane.b32.xlu1 %v553_v46, %s2321_s14  ;;  %v497_v46 = vunpack.c.l.b16 %v373_v43  ;;  %v2087_v43 = vld [vmem:[%s3295_s1 + $0x10] sm:$0xff] }
  0x4a   : > { %795 = vrot.lane.b32.xlu2 %v751_v27, %s2318_s26  ;;  %v505_v27 = vpack.c.b16 %v489_v22, %v489_v22  ;;  %v677_v22 = vshll.u32 %v2588_v10, 16 }
  0x4b   : > { %v2568_v53 = vpack.c.b16 %v497_v46, %v497_v46  ;;  %v779_v46 = vrot.slane %v2552_v45, 1 }
  0x4c   : > { %v574_v35 = vshll.u32 %v505_v27, 16  ;;  %v756_v58 = vrot.slane %v505_v27, 1  ;;  %v634_v27 = vshll.u32 %v510_v9, 16  ;;  %v679_v30 = vrot.slane %v677_v22, 1 }
  0x4d   : > { %v670_v5 = vshll.u32 %v2568_v53, 16  ;;  %v780_v49 = vrot.slane %v2568_v53, 1  ;;  %v2085_v53 = vld [vmem:[%s3295_s1] sm:$0xff]  ;;  %v506_v9 = vpack.c.b16 %v490_v4, %v490_v4 }
  0x4e   : > { %v576_v39 = vrot.slane %v574_v35, 1  ;;  %v2585_v8 = vsel %vm742_vm0, %v755_v57, %v756_v58  ;;  %v636_v35 = vrot.slane %v634_v27, 1  ;;  %v680_v36 = vor.u32 %v679_v30, %v675_v29  ;;  %v367_v27 = vld [vmem:[%s2430_s23 + $0x80] sm:$0x1] }
  0x4f   : > { %v672_v14 = vrot.slane %v670_v5, 1  ;;  %v2651_v54 = vsel %vm742_vm0, %v779_v46, %v780_v49  ;;  %v783_v57 = vrot.slane %v2601_v21, 1  ;;  %v586_v19 = vshll.u32 %v506_v9, 16 }
  0x50   : > { %v2555_v47 = vsel %vm517_vm1, %v572_v38, %v576_v39  ;;  %v2088_v39 = vld [vmem:[%s3295_s1 + $0x18] sm:$0xff]  ;;  %v2631_v41 = vsel %vm517_vm1, %v632_v34, %v636_v35  ;;  %v2634_v42 = vsel %vm517_vm1, %v680_v36, %v684_v37  ;;  %v495_v35 = vunpack.c.l.b16 %v367_v27 }
  0x51   : > { %1031 = vrot.lane.b32.xlu0 %v2499_v63, %s2319_s11  ;;  %832 = vrot.lane.b32.xlu1 %v2467_v40, %s3286_s24  ;;  %v2608_v24 = vsel %vm517_vm1, %v668_v13, %v672_v14  ;;  %v2667_v59 = vsel %vm742_vm0, %v782_v56, %v783_v57  ;;  %v579_v14 = vshrl.u32 %v2679_v3, 16  ;;  %v588_v22 = vrot.slane %v586_v19, 1  ;;  %v2709_v34 = vld [vmem:[%s2430_s23 + $0x78] sm:$0xff] }
  0x52   : > { %805 = vrot.lane.b32.xlu2 %v2503_v6, %s2318_s26  ;;  %1431 = vmatpush.bf16.msra.mxu0 %v2088_v39  ;;  %v758_v36 = vrot.slane %v2679_v3, 1  ;;  %v511_v46 = vpack.c.b16 %v495_v35, %v495_v35  ;;  %v641_v49 = vshll.u32 %v2709_v34, 16 }
  0x53   : > { %2122 = vmatpush.bf16.msra.mxu2 %v2088_v39  ;;  %2123 = vmatpush.bf16.msra.mxu3 %v2088_v39  ;;  %v584_v21 = vor.u32 %v583_v17, %v579_v14  ;;  %v355_v17 = vld [vmem:[%s2430_s23 + $0x50] sm:$0x1] }
  0x54   : > { %2121 = vmatpush.bf16.msra.mxu1 %v2088_v39  ;;  %v646_v60 = vshll.u32 %v511_v46, 16  ;;  %v774_v27 = vrot.slane %v511_v46, 1 }
  0x55   : > { %v2706_v33 = vsel %vm517_vm1, %v584_v21, %v588_v22  ;;  %v491_v22 = vunpack.c.l.b16 %v355_v17 }
  0x56   : > { %1432 = vmatpush.bf16.msra.mxu0 %v2087_v43  ;;  %v648_v11 = vrot.slane %v646_v60, 1 }
  0x57   : > { %2125 = vmatpush.bf16.msra.mxu2 %v2087_v43  ;;  %2126 = vmatpush.bf16.msra.mxu3 %v2087_v43 }
  0x58   : > { %2124 = vmatpush.bf16.msra.mxu1 %v2087_v43  ;;  %v759_v43 = vrot.slane %v506_v9, 1 }
  0x59   : > { %724 = vrot.lane.b32.xlu0 %v2518_v15, %s2321_s14  ;;  %842 = vrot.lane.b32.xlu1 %v2521_v16, %s3286_s24 }
  0x5a   : > { %914 = vrot.lane.b32.xlu2 %v2499_v63, %s2320_s12  ;;  %1433 = vmatpush.bf16.msra.mxu0 %v2086_v51  ;;  %v2728_v57 = vsel %vm742_vm0, %v758_v36, %v759_v43 }
  0x5b   : > { %2128 = vmatpush.bf16.msra.mxu2 %v2086_v51  ;;  %2129 = vmatpush.bf16.msra.mxu3 %v2086_v51 }
  0x5c   : > { %2127 = vmatpush.bf16.msra.mxu1 %v2086_v51 }
  0x5e   : > { %1434 = vmatpush.bf16.msra.mxu0 %v2085_v53 }
  0x5f   : > { %2131 = vmatpush.bf16.msra.mxu2 %v2085_v53  ;;  %2132 = vmatpush.bf16.msra.mxu3 %v2085_v53 }
  0x60   : > { %2130 = vmatpush.bf16.msra.mxu1 %v2085_v53 }
  0x61   : > { %879 = vrot.lane.b32.xlu0 %v2480_v52, %s2322_s16  ;;  %951 = vrot.lane.b32.xlu1 %v2524_v18, %s2317_s25 }
  0x62   : > { %732 = vrot.lane.b32.xlu2 %v2537_v32, %s2321_s14 }
  0x69   : > { %889 = vrot.lane.b32.xlu0 %v2549_v44, %s2322_s16  ;;  %998 = vrot.lane.b32.xlu1 %v2555_v47, %s2323_s19 }
  0x6a   : > { %813 = vrot.lane.b32.xlu2 %v2558_v48, %s2318_s26 }
  0x71   : > { %924 = vrot.lane.b32.xlu0 %v2577_v61, %s2320_s12  ;;  %1033 = vrot.lane.b32.xlu1 %v2585_v8, %s2319_s11 }
  0x72   : > { %850 = vrot.lane.b32.xlu2 %v2552_v45, %s3286_s24  ;;  %s3296_s24 = smov 24  }
  0x79   : > { %961 = vrot.lane.b32.xlu0 %v2580_v62, %s2317_s25  ;;  %897 = vrot.lane.b32.xlu1 %v2608_v24, %s2322_s16 }
  0x7a   : > { %1043 = vrot.lane.b32.xlu2 %v2612_v28, %s2319_s11 }
  0x7c   : > { %v2625_v38 = vpop.permute.xlu2 %947 }
  0x81   : > { %1008 = vrot.lane.b32.xlu0 %v2631_v41, %s2323_s19  ;;  %969 = vrot.lane.b32.xlu1 %v2588_v10, %s2317_s25 }
  0x82   : > { %1016 = vrot.lane.b32.xlu2 %v2634_v42, %s2323_s19 }
  0x84   : > { %v911_v50 = vpop.permute.xlu2 %910 }
  0x89   : > { %932 = vrot.lane.b32.xlu0 %v2651_v54, %s2320_s12  ;;  %716 = vrot.lane.b32.xlu1 %v2480_v52, %s2321_s14 }
  0x8a   : > { %797 = vrot.lane.b32.xlu2 %v2499_v63, %s2318_s26 }
  0x8c   : > { %v2664_v58 = vpop.permute.xlu2 %712 }
  0x8d   : > { %v1065_v4 = vsel %vm1061_vm2, %v2433_v0, %v2664_v58 }
  0x91   : > { %1051 = vrot.lane.b32.xlu0 %v2667_v59, %s2319_s11  ;;  %834 = vrot.lane.b32.xlu1 %v2524_v18, %s3296_s24 }
  0x92   : > { %807 = vrot.lane.b32.xlu2 %v2577_v61, %s2318_s26 }
  0x93   : > { %v829_v52 = vpop.permute.xlu1 %828 }
  0x94   : > { %v2675_v63 = vpop.permute.xlu2 %877 }
  0x99   : > { %726 = vrot.lane.b32.xlu0 %v2549_v44, %s2321_s14  ;;  %844 = vrot.lane.b32.xlu1 %v2580_v62, %s3296_s24 }
  0x9a   : > { %916 = vrot.lane.b32.xlu2 %v2585_v8, %s2320_s12 }
  0x9b   : > { %v792_v5 = vpop.permute.xlu0 %791  ;;  %v1030_v12 = vpop.permute.xlu1 %1029 }
  0x9c   : > { %v2688_v13 = vpop.permute.xlu2 %996 }
  0xa1   : > { %881 = vrot.lane.b32.xlu0 %v2555_v47, %s2322_s16  ;;  %953 = vrot.lane.b32.xlu1 %v2679_v3, %s2317_s25 }
  0xa2   : > { %734 = vrot.lane.b32.xlu2 %v2608_v24, %s2321_s14 }
  0xa3   : > { %v711_v20 = vpop.permute.xlu0 %710  ;;  %v876_v25 = vpop.permute.xlu1 %875 }
  0xa4   : > { %v1063_v23 = vsel %vm1061_vm2, %v2439_v2, %v711_v20  ;;  %v2699_v26 = vpop.permute.xlu2 %795  ;;  %v2745_v20 = vld [vmem:[%s2430_s23 + $0x48] sm:$0xff] }
  0xa5   : > { %v1096_v29 = vsel %vm1094_vm3, %v1063_v23, %v792_v5  ;;  %v593_v0 = vshll.u32 %v2745_v20, 16 }
  0xa6   : > { %v1129_v30 = vsel %vm1127_vm4, %v1096_v29, %v829_v52  ;;  %v643_v52 = vrot.slane %v641_v49, 1  ;;  %v507_v29 = vpack.c.b16 %v491_v22, %v491_v22 }
  0xa7   : > { %v1162_v31 = vsel %vm1160_vm5, %v1129_v30, %v876_v25  ;;  %v773_v25 = vrot.slane %v2709_v34, 1 }
  0xa8   : > { %v1195_v2 = vsel %vm1193_vm6, %v1162_v31, %v911_v50  ;;  %v598_v49 = vshll.u32 %v507_v29, 16 }
  0xa9   : > { %891 = vrot.lane.b32.xlu0 %v2631_v41, %s2322_s16  ;;  %1000 = vrot.lane.b32.xlu1 %v2706_v33, %s2323_s19  ;;  %v1228_v37 = vsel %vm1226_vm7, %v1195_v2, %v2625_v38  ;;  %v639_v38 = vshrl.u32 %v2709_v34, 16  ;;  %v379_v2 = vld [vmem:[%s2430_s23 + $0xb0] sm:$0x1]  ;;  %v2767_v43 = vsel %vm742_vm0, %v773_v25, %v774_v27 }
  0xaa   : > { %815 = vrot.lane.b32.xlu2 %v2651_v54, %s2318_s26  ;;  %v499_v46 = vunpack.c.l.b16 %v379_v2  ;;  %v762_v2 = vrot.slane %v507_v29, 1 }
  0xab   : > { %v995_v39 = vpop.permute.xlu0 %994  ;;  %v831_v51 = vpop.permute.xlu1 %830  ;;  %v644_v9 = vor.u32 %v643_v52, %v639_v38  ;;  %v600_v52 = vrot.slane %v598_v49, 1 }
  0xac   : > { %v1261_v50 = vsel %vm1259_vm8, %v1228_v37, %v995_v39  ;;  %v2723_v53 = vpop.permute.xlu2 %805  ;;  %v591_v37 = vshrl.u32 %v2745_v20, 16  ;;  %v595_v39 = vrot.slane %v593_v0, 1  ;;  %v515_v60 = vpack.c.b16 %v499_v46, %v499_v46 }
  0xad   : > { %v1294_v56 = vsel %vm1292_vm9, %v1261_v50, %v1030_v12  ;;  %v2748_v21 = vsel %vm517_vm1, %v644_v9, %v648_v11  ;;  %v2770_v50 = vld [vmem:[%s2430_s23 + $0xa8] sm:$0xff] }
  0xae   : > { %1985 = vmatmul.msk.bf16.vlgmr.msra.gmra.mxu0 %vm1325_vm10, %v1294_v56  ;;  %v687_v17 = vshrl.u32 %v2770_v50, 16  ;;  %v694_v22 = vshll.u32 %v515_v60, 16  ;;  %v785_v29 = vrot.slane %v2770_v50, 1 }
  0xb0   : > { %v696_v0 = vrot.slane %v694_v22, 1 }
  0xb1   : > { %926 = vrot.lane.b32.xlu0 %v2612_v28, %s2320_s12  ;;  %1035 = vrot.lane.b32.xlu1 %v2728_v57, %s2319_s11 }
  0xb2   : > { %720 = vrot.lane.b32.xlu2 %v2706_v33, %s2321_s14 }
  0xb3   : > { %v794_v5 = vpop.permute.xlu0 %793  ;;  %v950_v12 = vpop.permute.xlu1 %949 }
  0xb4   : > { %v2740_v14 = vpop.permute.xlu2 %914  ;;  %v1098_v19 = vsel %vm1094_vm3, %v1065_v4, %v794_v5  ;;  %v689_v4 = vshll.u32 %v2770_v50, 16 }
  0xb5   : > { %v1131_v23 = vsel %vm1127_vm4, %v1098_v19, %v831_v51 }
  0xb6   : > { %v1164_v30 = vsel %vm1160_vm5, %v1131_v23, %v2675_v63  ;;  %v596_v63 = vor.u32 %v595_v39, %v591_v37  ;;  %v691_v19 = vrot.slane %v689_v4, 1 }
  0xb8   : > { %v692_v23 = vor.u32 %v691_v19, %v687_v17 }
  0xb9   : > { %963 = vrot.lane.b32.xlu0 %v2709_v34, %s2317_s25  ;;  %1010 = vrot.lane.b32.xlu1 %v2748_v21, %s2323_s19 }
  0xba   : > { %801 = vrot.lane.b32.xlu2 %v2728_v57, %s2318_s26  ;;  %v2797_v27 = vsel %vm517_vm1, %v692_v23, %v696_v0 }
  0xbb   : > { %v913_v58 = vpop.permute.xlu0 %912  ;;  %v715_v31 = vpop.permute.xlu1 %714 }
  0xbc   : > { %v2761_v35 = vpop.permute.xlu2 %732  ;;  %v1197_v36 = vsel %vm1193_vm6, %v1164_v30, %v913_v58  ;;  %v761_v30 = vrot.slane %v2745_v20, 1  ;;  %v1067_v49 = vsel %vm1061_vm2, %v2436_v1, %v715_v31 }
  0xbd   : > { %v1230_v51 = vsel %vm1226_vm7, %v1197_v36, %v950_v12  ;;  %v2787_v12 = vsel %vm517_vm1, %v596_v63, %v600_v52  ;;  %v786_v63 = vrot.slane %v515_v60, 1 }
  0xbe   : > { %v1263_v38 = vsel %vm1259_vm8, %v1230_v51, %v2688_v13  ;;  %v2809_v46 = vsel %vm742_vm0, %v761_v30, %v762_v2  ;;  %v1100_v51 = vsel %vm1094_vm3, %v1067_v49, %v2699_v26 }
  0xbf   : > { %v2823_v26 = vsel %vm742_vm0, %v785_v29, %v786_v63 }
  0xc1   : > { %852 = vrot.lane.b32.xlu0 %v2588_v10, %s3296_s24  ;;  %1045 = vrot.lane.b32.xlu1 %v2767_v43, %s2319_s11 }
  0xc2   : > { %838 = vrot.lane.b32.xlu2 %v2745_v20, %s3296_s24 }
  0xc3   : > { %v1032_v56 = vpop.permute.xlu0 %1031  ;;  %v833_v9 = vpop.permute.xlu1 %832 }
  0xc4   : > { %v1296_v5 = vsel %vm1292_vm9, %v1263_v38, %v1032_v56  ;;  %v2783_v11 = vpop.permute.xlu2 %813  ;;  %v1133_v1 = vsel %vm1127_vm4, %v1100_v51, %v833_v9 }
  0xc5   : > { %1986 = vmatmul.msk.bf16.gmra.mxu0 %vm1325_vm10, %v1296_v5 }
  0xc9   : > { %899 = vrot.lane.b32.xlu0 %v2634_v42, %s2322_s16  ;;  %885 = vrot.lane.b32.xlu1 %v2787_v12, %s2322_s16 }
  0xca   : > { %971 = vrot.lane.b32.xlu2 %v2770_v50, %s2317_s25 }
  0xcb   : > { %v725_v13 = vpop.permute.xlu0 %724  ;;  %v843_v58 = vpop.permute.xlu1 %842 }
  0xcc   : > { %v851_v25 = vpop.permute.xlu2 %850 }
  0xd1   : > { %934 = vrot.lane.b32.xlu0 %v2667_v59, %s2320_s12  ;;  %1018 = vrot.lane.b32.xlu1 %v2797_v27, %s2323_s19 }
  0xd2   : > { %957 = vrot.lane.b32.xlu2 %v2489_v55, %s2317_s25 }
  0xd3   : > { %v880_v36 = vpop.permute.xlu0 %879  ;;  %v952_v37 = vpop.permute.xlu1 %951 }
  0xd4   : > { %v1044_v39 = vpop.permute.xlu2 %1043  ;;  %v1166_v52 = vsel %vm1160_vm5, %v1133_v1, %v880_v36  ;;  %v1085_v36 = vsel %vm1061_vm2, %v2506_v7, %v2761_v35 }
  0xd5   : > { %v1199_v4 = vsel %vm1193_vm6, %v1166_v52, %v2740_v14 }
  0xd6   : > { %v1232_v60 = vsel %vm1226_vm7, %v1199_v4, %v952_v37 }
  0xd9   : > { %920 = vrot.lane.b32.xlu0 %v2809_v46, %s2320_s12  ;;  %1004 = vrot.lane.b32.xlu1 %v2518_v15, %s2323_s19 }
  0xda   : > { %1039 = vrot.lane.b32.xlu2 %v2503_v6, %s2319_s11 }
  0xdb   : > { %v890_v56 = vpop.permute.xlu0 %889  ;;  %v999_v31 = vpop.permute.xlu1 %998 }
  0xdc   : > { %v1017_v38 = vpop.permute.xlu2 %1016  ;;  %v1265_v9 = vsel %vm1259_vm8, %v1232_v60, %v999_v31 }
  0xe1   : > { %1053 = vrot.lane.b32.xlu0 %v2823_v26, %s2319_s11  ;;  %799 = vrot.lane.b32.xlu1 %v2585_v8, %s2318_s26  ;;  %v1077_v8 = vsel %vm1061_vm2, %v2489_v55, %v725_v13 }
  0xe2   : > { %728 = vrot.lane.b32.xlu2 %v2631_v41, %s2321_s14  ;;  %v1110_v0 = vsel %vm1094_vm3, %v1077_v8, %v2723_v53 }
  0xe3   : > { %v925_v5 = vpop.permute.xlu0 %924  ;;  %v1034_v17 = vpop.permute.xlu1 %1033  ;;  %v1143_v30 = vsel %vm1127_vm4, %v1110_v0, %v843_v58 }
  0xe4   : > { %v798_v19 = vpop.permute.xlu2 %797  ;;  %v1298_v22 = vsel %vm1292_vm9, %v1265_v9, %v1034_v17  ;;  %v382_v17 = vld [vmem:[%s2430_s23 + $0xbc] sm:$0x1] }
  0xe5   : > { %1987 = vmatmul.msk.bf16.gmra.mxu0 %vm1325_vm10, %v1298_v22 }
  0xe9   : > { %718 = vrot.lane.b32.xlu0 %v2555_v47, %s2321_s14  ;;  %809 = vrot.lane.b32.xlu1 %v2612_v28, %s2318_s26  ;;  %v1176_v47 = vsel %vm1160_vm5, %v1143_v30, %v890_v56 }
  0xea   : > { %883 = vrot.lane.b32.xlu2 %v2706_v33, %s2322_s16  ;;  %v1209_v13 = vsel %vm1193_vm6, %v1176_v47, %v925_v5 }
  0xeb   : > { %v962_v41 = vpop.permute.xlu0 %961  ;;  %v898_v14 = vpop.permute.xlu1 %897 }
  0xec   : > { %v2845_v23 = vpop.permute.xlu2 %807  ;;  %v1242_v28 = vsel %vm1226_vm7, %v1209_v13, %v962_v41 }
  0xf1   : > { %836 = vrot.lane.b32.xlu0 %v2679_v3, %s3296_s24  ;;  %918 = vrot.lane.b32.xlu1 %v2728_v57, %s2320_s12  ;;  %v1118_v57 = vsel %vm1094_vm3, %v1085_v36, %v2783_v11 }
  0xf2   : > { %893 = vrot.lane.b32.xlu2 %v2748_v21, %s2322_s16  ;;  %v1151_v49 = vsel %vm1127_vm4, %v1118_v57, %v851_v25 }
  0xf3   : > { %v1009_v33 = vpop.permute.xlu0 %1008  ;;  %v970_v2 = vpop.permute.xlu1 %969  ;;  %v1184_v35 = vsel %vm1160_vm5, %v1151_v49, %v898_v14  ;;  %v2921_v14 = vld [vmem:[%s2430_s23 + $0xb4] sm:$0xff] }
  0xf4   : > { %v1275_v53 = vsel %vm1259_vm8, %v1242_v28, %v1009_v33  ;;  %v917_v58 = vpop.permute.xlu2 %916  ;;  %v701_v30 = vshll.u32 %v2921_v14, 16  ;;  %v788_v57 = vrot.slane %v2921_v14, 1 }
  0xf5   : > { %v1308_v37 = vsel %vm1292_vm9, %v1275_v53, %v1044_v39 }
  0xf6   : > { %1992 = vmatmul.msk.bf16.vlgmr.msra.gmra.mxu2 %vm1325_vm10, %v1308_v37  ;;  %v703_v36 = vrot.slane %v701_v30, 1 }
  0xf9   : > { %846 = vrot.lane.b32.xlu0 %v2709_v34, %s3296_s24  ;;  %736 = vrot.lane.b32.xlu1 %v2634_v42, %s2321_s14 }
  0xfa   : > { %928 = vrot.lane.b32.xlu2 %v2767_v43, %s2320_s12 }
  0xfb   : > { %v933_v51 = vpop.permute.xlu0 %932  ;;  %v717_v39 = vpop.permute.xlu1 %716 }
  0xfc   : > { %v2875_v29 = vpop.permute.xlu2 %734  ;;  %v1217_v63 = vsel %vm1193_vm6, %v1184_v35, %v933_v51  ;;  %v1069_v5 = vsel %vm1061_vm2, %v2467_v40, %v717_v39 }
  0xfd   : > { %v1250_v11 = vsel %vm1226_vm7, %v1217_v63, %v970_v2  ;;  %v1102_v9 = vsel %vm1094_vm3, %v1069_v5, %v798_v19  ;;  %v500_v19 = vunpack.c.l.b16 %v382_v17  ;;  %v1087_v17 = vsel %vm1061_vm2, %v2552_v45, %v2875_v29 }
  0xfe   : > { %v1283_v25 = vsel %vm1259_vm8, %v1250_v11, %v1017_v38 }
 0x101   : > { %955 = vrot.lane.b32.xlu0 %v2745_v20, %s2317_s25  ;;  %817 = vrot.lane.b32.xlu1 %v2667_v59, %s2318_s26 }
 0x102   : > { %965 = vrot.lane.b32.xlu2 %v2506_v7, %s2317_s25 }
 0x103   : > { %v1052_v42 = vpop.permute.xlu0 %1051  ;;  %v835_v1 = vpop.permute.xlu1 %834 }
 0x104   : > { %v1316_v56 = vsel %vm1292_vm9, %v1283_v25, %v1052_v42  ;;  %v2887_v31 = vpop.permute.xlu2 %815  ;;  %v1135_v22 = vsel %vm1127_vm4, %v1102_v9, %v835_v1 }
 0x105   : > { %1996 = vmatmul.msk.bf16.vlgmr.msra.gmra.mxu3 %vm1325_vm10, %v1316_v56 }
 0x109   : > { %1002 = vrot.lane.b32.xlu0 %v2787_v12, %s2323_s19  ;;  %722 = vrot.lane.b32.xlu1 %v2787_v12, %s2321_s14 }
 0x10a   : > { %854 = vrot.lane.b32.xlu2 %v2770_v50, %s3296_s24 }
 0x10b   : > { %v727_v59 = vpop.permute.xlu0 %726  ;;  %v845_v52 = vpop.permute.xlu1 %844 }
 0x10c   : > { %v2896_v38 = vpop.permute.xlu2 %720 }
 0x111   : > { %1037 = vrot.lane.b32.xlu0 %v2809_v46, %s2319_s11  ;;  %803 = vrot.lane.b32.xlu1 %v2809_v46, %s2318_s26 }
 0x112   : > { %901 = vrot.lane.b32.xlu2 %v2797_v27, %s2322_s16 }
 0x113   : > { %v882_v4 = vpop.permute.xlu0 %881  ;;  %v954_v12 = vpop.permute.xlu1 %953 }
 0x114   : > { %v2904_v60 = vpop.permute.xlu2 %801  ;;  %v1168_v40 = vsel %vm1160_vm5, %v1135_v22, %v882_v4  ;;  %v2083_v22 = vld [vmem:[%s2430_s23 + $0xc0] sm:$0xff] }
 0x115   : > { %v1201_v0 = vsel %vm1193_vm6, %v1168_v40, %v917_v58  ;;  %v699_v58 = vshrl.u32 %v2921_v14, 16 }
 0x116   : > { %v1234_v47 = vsel %vm1226_vm7, %v1201_v0, %v954_v12 }
 0x117   : > { %v704_v35 = vor.u32 %v703_v36, %v699_v58 }
 0x119   : > { %1012 = vrot.lane.b32.xlu0 %v2537_v32, %s2323_s19  ;;  %840 = vrot.lane.b32.xlu1 %v2489_v55, %s3296_s24  ;;  %v516_v55 = vpack.c.b16 %v500_v19, %v500_v19  ;;  %v866_v19 = vshll.u32 %v2083_v22, 16 }
 0x11a   : > { %936 = vrot.lane.b32.xlu2 %v2823_v26, %s2320_s12 }
 0x11b   : > { %v892_v46 = vpop.permute.xlu0 %891  ;;  %v1001_v8 = vpop.permute.xlu1 %1000  ;;  %v706_v37 = vshll.u32 %v516_v55, 16  ;;  %v789_v49 = vrot.slane %v516_v55, 1 }
 0x11c   : > { %v2917_v41 = vpop.permute.xlu2 %838  ;;  %v1267_v28 = vsel %vm1259_vm8, %v1234_v47, %v1001_v8  ;;  %v864_v47 = vshrl.u32 %v2083_v22, 16 }
 0x11d   : > { %v2944_v51 = vsel %vm742_vm0, %v788_v57, %v789_v49  ;;  %v708_v39 = vrot.slane %v706_v37, 1 }
 0x121   : > { %1047 = vrot.lane.b32.xlu0 %v2558_v48, %s2319_s11  ;;  %973 = vrot.lane.b32.xlu1 %v2921_v14, %s2317_s25 }
 0x122   : > { %922 = vrot.lane.b32.xlu2 %v2503_v6, %s2320_s12  ;;  %v1079_v6 = vsel %vm1061_vm2, %v2521_v16, %v727_v59 }
 0x123   : > { %v927_v13 = vpop.permute.xlu0 %926  ;;  %v1036_v33 = vpop.permute.xlu1 %1035  ;;  %v1112_v63 = vsel %vm1094_vm3, %v1079_v6, %v2845_v23 }
 0x124   : > { %v2933_v53 = vpop.permute.xlu2 %971  ;;  %v1300_v2 = vsel %vm1292_vm9, %v1267_v28, %v1036_v33  ;;  %v1145_v56 = vsel %vm1127_vm4, %v1112_v63, %v845_v52 }
 0x125   : > { %1988 = vmatmul.msk.bf16.gmra.mxu0 %vm1325_vm10, %v1300_v2  ;;  %v1178_v1 = vsel %vm1160_vm5, %v1145_v56, %v892_v46 }
 0x129   : > { %887 = vrot.lane.b32.xlu0 %v2518_v15, %s2322_s16  ;;  %959 = vrot.lane.b32.xlu1 %v2521_v16, %s2317_s25  ;;  %v2954_v15 = vsel %vm517_vm1, %v704_v35, %v708_v39  ;;  %v1211_v16 = vsel %vm1193_vm6, %v1178_v1, %v927_v13  ;;  %v868_v13 = vrot.slane %v866_v19, 1 }
 0x12a   : > { %1055 = vrot.lane.b32.xlu2 %v2944_v51, %s2319_s11 }
 0x12b   : > { %v964_v11 = vpop.permute.xlu0 %963  ;;  %v1011_v42 = vpop.permute.xlu1 %1010  ;;  %v869_v37 = vor.u32 %v868_v13, %v864_v47 }
 0x12c   : > { %v958_v25 = vpop.permute.xlu2 %957  ;;  %v1244_v59 = vsel %vm1226_vm7, %v1211_v16, %v964_v11  ;;  %v2084_v16 = vld [vmem:[%s2430_s23 + $0xcc] sm:$0xff] }
 0x12d   : > { %v1277_v52 = vsel %vm1259_vm8, %v1244_v59, %v1011_v42  ;;  %v388_v42 = vld [vmem:[%s2430_s23 + $0xd4] sm:$0x1] }
 0x12e   : > { %v980_v1 = vunpack.c.l.b16 %v388_v42 }
 0x131   : > { %1020 = vrot.lane.b32.xlu0 %v2954_v15, %s2323_s19  ;;  %1041 = vrot.lane.b32.xlu1 %v2577_v61, %s2319_s11 }
 0x132   : > { %730 = vrot.lane.b32.xlu2 %v2748_v21, %s2321_s14 }
 0x133   : > { %v853_v23 = vpop.permute.xlu0 %852  ;;  %v1046_v4 = vpop.permute.xlu1 %1045 }
 0x134   : > { %v1310_v12 = vsel %vm1292_vm9, %v1277_v52, %v1046_v4  ;;  %v1040_v5 = vpop.permute.xlu2 %1039  ;;  %v985_v52 = vshll.u32 %v2084_v16, 16 }
 0x135   : > { %1993 = vmatmul.msk.bf16.gmra.mxu2 %vm1325_vm10, %v1310_v12  ;;  %v1026_v12 = vrot.slane %v2084_v16, 1 }
 0x139   : > { %1006 = vrot.lane.b32.xlu0 %v2549_v44, %s2323_s19  ;;  %848 = vrot.lane.b32.xlu1 %v2506_v7, %s3296_s24  ;;  %v1073_v7 = vsel %vm1061_vm2, %v2679_v3, %v2896_v38 }
 0x13a   : > { %895 = vrot.lane.b32.xlu2 %v2537_v32, %s2322_s16  ;;  %v385_v32 = vld [vmem:[%s2430_s23 + $0xc8] sm:$0x1] }
 0x13b   : > { %v900_v61 = vpop.permute.xlu0 %899  ;;  %v886_v21 = vpop.permute.xlu1 %885  ;;  %v861_v8 = vunpack.c.l.b16 %v385_v32 }
 0x13c   : > { %v2974_v9 = vpop.permute.xlu2 %728 }
 0x13d   : > { %v862_v40 = vpack.c.b16 %v861_v8, %v861_v8 }
 0x13f   : > { %v871_v28 = vshll.u32 %v862_v40, 16  ;;  %v908_v6 = vrot.slane %v862_v40, 1 }
 0x141   : > { %811 = vrot.lane.b32.xlu0 %v2767_v43, %s2318_s26  ;;  %930 = vrot.lane.b32.xlu1 %v2558_v48, %s2320_s12  ;;  %v1106_v43 = vsel %vm1094_vm3, %v1073_v7, %v2904_v60  ;;  %v873_v57 = vrot.slane %v871_v28, 1 }
 0x142   : > { %819 = vrot.lane.b32.xlu2 %v2823_v26, %s2318_s26  ;;  %v1120_v26 = vsel %vm1094_vm3, %v1087_v17, %v2887_v31  ;;  %v1139_v3 = vsel %vm1127_vm4, %v1106_v43, %v2917_v41 }
 0x143   : > { %v935_v44 = vpop.permute.xlu0 %934  ;;  %v1019_v46 = vpop.permute.xlu1 %1018  ;;  %v1153_v29 = vsel %vm1127_vm4, %v1120_v26, %v853_v23  ;;  %v1172_v38 = vsel %vm1160_vm5, %v1139_v3, %v886_v21  ;;  %v981_v23 = vpack.c.b16 %v980_v1, %v980_v1  ;;  %v987_v21 = vrot.slane %v985_v52, 1 }
 0x144   : > { %v2992_v48 = vpop.permute.xlu2 %883 }
 0x149   : > { %738 = vrot.lane.b32.xlu0 %v2797_v27, %s2321_s14  ;;  %856 = vrot.lane.b32.xlu1 %v2921_v14, %s3296_s24  ;;  %v1186_v27 = vsel %vm1160_vm5, %v1153_v29, %v900_v61  ;;  %v983_v61 = vshrl.u32 %v2084_v16, 16 }
 0x14a   : > { %1014 = vrot.lane.b32.xlu2 %v2608_v24, %s2323_s19  ;;  %v1219_v41 = vsel %vm1193_vm6, %v1186_v27, %v935_v44  ;;  %v990_v44 = vshll.u32 %v981_v23, 16 }
 0x14b   : > { %v921_v60 = vpop.permute.xlu0 %920  ;;  %v1005_v0 = vpop.permute.xlu1 %1004  ;;  %v1252_v33 = vsel %vm1226_vm7, %v1219_v41, %v2933_v53  ;;  %v988_v32 = vor.u32 %v987_v21, %v983_v61 }
 0x14c   : > { %v1205_v31 = vsel %vm1193_vm6, %v1172_v38, %v921_v60  ;;  %v1285_v2 = vsel %vm1259_vm8, %v1252_v33, %v1019_v46  ;;  %v3022_v58 = vpop.permute.xlu2 %893 }
 0x14d   : > { %v1238_v55 = vsel %vm1226_vm7, %v1205_v31, %v958_v25 }
 0x14e   : > { %v1271_v30 = vsel %vm1259_vm8, %v1238_v55, %v1005_v0  ;;  %v1081_v55 = vsel %vm1061_vm2, %v2580_v62, %v2974_v9 }
 0x14f   : > { %v1304_v24 = vsel %vm1292_vm9, %v1271_v30, %v1040_v5 }
 0x150   : > { %1990 = vmatmul.msk.bf16.vlgmr.msra.gmra.mxu1 %vm1325_vm10, %v1304_v24 }
 0x151   : > { %967 = vrot.lane.b32.xlu0 %v2552_v45, %s2317_s25  ;;  %1049 = vrot.lane.b32.xlu1 %v2651_v54, %s2319_s11  ;;  %v907_v45 = vrot.slane %v2083_v22, 1  ;;  %v874_v54 = vsel %vm517_vm1, %v869_v37, %v873_v57 }
 0x152   : > { %938 = vrot.lane.b32.xlu2 %v2944_v51, %s2320_s12 }
 0x153   : > { %v1054_v36 = vpop.permute.xlu0 %1053  ;;  %v800_v49 = vpop.permute.xlu1 %799  ;;  %v909_v35 = vsel %vm742_vm0, %v907_v45, %v908_v6 }
 0x154   : > { %v1318_v53 = vsel %vm1292_vm9, %v1285_v2, %v1054_v36  ;;  %v929_v11 = vpop.permute.xlu2 %928 }
 0x155   : > { %1997 = vmatmul.msk.bf16.gmra.mxu3 %vm1325_vm10, %v1318_v53 }
 0x159   : > { %903 = vrot.lane.b32.xlu0 %v2954_v15, %s2322_s16  ;;  %1022 = vrot.lane.b32.xlu1 %v874_v54, %s2323_s19 }
 0x15a   : > { %1057 = vrot.lane.b32.xlu2 %v909_v35, %s2319_s11 }
 0x15b   : > { %v719_v39 = vpop.permute.xlu0 %718  ;;  %v810_v63 = vpop.permute.xlu1 %809 }
 0x15c   : > { %v966_v59 = vpop.permute.xlu2 %965  ;;  %v1071_v8 = vsel %vm1061_vm2, %v2524_v18, %v719_v39  ;;  %v1114_v24 = vsel %vm1094_vm3, %v1081_v55, %v810_v63 }
 0x15d   : > { %v1104_v26 = vsel %vm1094_vm3, %v1071_v8, %v800_v49 }
 0x161   : > { %975 = vrot.lane.b32.xlu0 %v2083_v22, %s2317_s25  ;;  %821 = vrot.lane.b32.xlu1 %v2944_v51, %s2318_s26  ;;  %v1027_v51 = vrot.slane %v981_v23, 1 }
 0x162   : > { %858 = vrot.lane.b32.xlu2 %v2083_v22, %s3296_s24  ;;  %s319_s24 = scalar_lea.vmem [#allocation5], %s3209_s21 }
 0x163   : > { %v837_v25 = vpop.permute.xlu0 %836  ;;  %v919_v56 = vpop.permute.xlu1 %918  ;;  %v1028_v7 = vsel %vm742_vm0, %v1026_v12, %v1027_v51  ;;  %s3224_s23 = sshll.u32 %s319_s24, 4  ;;  %s1781_s23 = int_to_ptr.vmem [resolvable:$true] %s3224_s23 }
 0x164   : > { %v855_v46 = vpop.permute.xlu2 %854  ;;  %v1137_v3 = vsel %vm1127_vm4, %v1104_v26, %v837_v25 }
 0x165   : > { %v1170_v40 = vsel %vm1160_vm5, %v1137_v3, %v2992_v48 }
 0x166   : > { %v1203_v19 = vsel %vm1193_vm6, %v1170_v40, %v919_v56 }
 0x169   : > { %740 = vrot.lane.b32.xlu0 %v2954_v15, %s2321_s14  ;;  %940 = vrot.lane.b32.xlu1 %v909_v35, %s2320_s12  ;;  %v992_v15 = vrot.slane %v990_v44, 1  ;;  %s313_s12 = scalar_lea.vmem [#allocation3], %s3209_s21 }
 0x16a   : > { %977 = vrot.lane.b32.xlu2 %v2084_v16, %s2317_s25  ;;  %s1765_s25 = scalar_lea.hbm %s3284_s7, %s2306_s30  ;;  %s1767_s14 = sshll.u32 %s313_s12, 4  ;;  %s1768_s14 = int_to_ptr.vmem [resolvable:$true] %s1767_s14 }
 0x16b   : > { %v847_v4 = vpop.permute.xlu0 %846  ;;  %v737_v5 = vpop.permute.xlu1 %736  ;;  %v993_v22 = vsel %vm517_vm1, %v988_v32, %v992_v15 }
 0x16c   : > { %v902_v29 = vpop.permute.xlu2 %901  ;;  %v1147_v48 = vsel %vm1127_vm4, %v1114_v24, %v847_v4  ;;  %v1089_v53 = vsel %vm1061_vm2, %v2588_v10, %v737_v5 }
 0x16d   : > { %v1180_v13 = vsel %vm1160_vm5, %v1147_v48, %v3022_v58 }
 0x16e   : > { %v1213_v2 = vsel %vm1193_vm6, %v1180_v13, %v929_v11 }
 0x16f   : > { %v1246_v36 = vsel %vm1226_vm7, %v1213_v2, %v966_v59 }
 0x171   : > { %905 = vrot.lane.b32.xlu0 %v874_v54, %s2322_s16  ;;  %1059 = vrot.lane.b32.xlu1 %v1028_v7, %s2319_s11  ;;  %s1769_s16 = sshll.u32 %s1765_s25, 4  ;;  %s1753_s25 = scalar_lea.sflag [#allocation4], %s3209_s21  ;;  %s1770_s16 = int_to_ptr.hbm [resolvable:$true] %s1769_s16 }
 0x172   : > { %s2218_s1 = sshra.s32 %s1770_s16, 4  ;;  %s2219_s1 = int_to_ptr.hbm [resolvable:$true] %s2218_s1 }
 0x173   : > { %v956_v17 = vpop.permute.xlu0 %955  ;;  %v818_v43 = vpop.permute.xlu1 %817  ;;  %p2225_p1 = scmp.lt.s32.totalorder %s2219_s1, %s3284_s7 }
 0x174   : > { %v1236_v27 = vsel %vm1226_vm7, %v1203_v19, %v956_v17  ;;  %v937_v30 = vpop.permute.xlu2 %936  ;;  %v1122_v58 = vsel %vm1094_vm3, %v1089_v53, %v818_v43 }
 0x175   : > { %v1155_v6 = vsel %vm1127_vm4, %v1122_v58, %v855_v46 }
 0x176   : > { %v1188_v35 = vsel %vm1160_vm5, %v1155_v6, %v902_v29 }
 0x177   : > { %v1221_v11 = vsel %vm1193_vm6, %v1188_v35, %v937_v30 }
 0x179   : > { %1024 = vrot.lane.b32.xlu0 %v993_v22, %s2323_s19 }
 0x17b   : > { %v1003_v38 = vpop.permute.xlu0 %1002  ;;  %v723_v60 = vpop.permute.xlu1 %722 }
 0x17c   : > { %v1269_v31 = vsel %vm1259_vm8, %v1236_v27, %v1003_v38  ;;  %v923_v33 = vpop.permute.xlu2 %922  ;;  %v1075_v39 = vsel %vm1061_vm2, %v2745_v20, %v723_v60 }
 0x183   : > { %v1038_v0 = vpop.permute.xlu0 %1037  ;;  %v804_v41 = vpop.permute.xlu1 %803 }
 0x184   : > { %v1302_v18 = vsel %vm1292_vm9, %v1269_v31, %v1038_v0  ;;  %v1056_v49 = vpop.permute.xlu2 %1055  ;;  %v1108_v42 = vsel %vm1094_vm3, %v1075_v39, %v804_v41 }
 0x185   : > { %1989 = vmatmul.msk.bf16.gmra.mxu0 %vm1325_vm10, %v1302_v18 }
 0x18b   : > { %v1013_v47 = vpop.permute.xlu0 %1012  ;;  %v841_v28 = vpop.permute.xlu1 %840 }
 0x18c   : > { %v1279_v37 = vsel %vm1259_vm8, %v1246_v36, %v1013_v47  ;;  %v731_v63 = vpop.permute.xlu2 %730  ;;  %v1141_v56 = vsel %vm1127_vm4, %v1108_v42, %v841_v28  ;;  %v1436_v47 = vpop.f32.mrf.mxu0 }
 0x18d   : > { %v1083_v46 = vsel %vm1061_vm2, %v2709_v34, %v731_v63 }
 0x193   : > { %v1048_v62 = vpop.permute.xlu0 %1047  ;;  %v974_v57 = vpop.permute.xlu1 %973 }
 0x194   : > { %v1312_v9 = vsel %vm1292_vm9, %v1279_v37, %v1048_v62  ;;  %v1254_v25 = vsel %vm1226_vm7, %v1221_v11, %v974_v57  ;;  %v896_v12 = vpop.permute.xlu2 %895  ;;  %v1438_v37 = vpop.f32.mrf.mxu0 }
 0x195   : > { %1994 = vmatmul.msk.bf16.gmra.mxu2 %vm1325_vm10, %v1312_v9 }
 0x19b   : > { %v888_v45 = vpop.permute.xlu0 %887  ;;  %v960_v54 = vpop.permute.xlu1 %959 }
 0x19c   : > { %v1174_v59 = vsel %vm1160_vm5, %v1141_v56, %v888_v45  ;;  %v820_v7 = vpop.permute.xlu2 %819  ;;  %v1441_v58 = vpop.f32.mrf.mxu0 }
 0x19d   : > { %v1207_v20 = vsel %vm1193_vm6, %v1174_v59, %v923_v33  ;;  %v1471_v56 = vpop.f32.mrf.mxu2 }
 0x19e   : > { %v1240_v52 = vsel %vm1226_vm7, %v1207_v20, %v960_v54 }
 0x1a3   : > { %v1021_v10 = vpop.permute.xlu0 %1020  ;;  %v1042_v16 = vpop.permute.xlu1 %1041 }
 0x1a4   : > { %v1287_v1 = vsel %vm1259_vm8, %v1254_v25, %v1021_v10  ;;  %v1015_v22 = vpop.permute.xlu2 %1014  ;;  %v1443_v11 = vpop.f32.mrf.mxu0 }
 0x1a5   : > { %v1320_v23 = vsel %vm1292_vm9, %v1287_v1, %v1056_v49 }
 0x1a6   : > { %1998 = vmatmul.msk.bf16.gmra.mxu3 %vm1325_vm10, %v1320_v23 }
 0x1ab   : > { %v1007_v4 = vpop.permute.xlu0 %1006  ;;  %v849_v5 = vpop.permute.xlu1 %848 }
 0x1ac   : > { %v1273_v51 = vsel %vm1259_vm8, %v1240_v52, %v1007_v4  ;;  %v939_v19 = vpop.permute.xlu2 %938  ;;  %v1446_v42 = vpop.f32.mrf.mxu0 }
 0x1ad   : > { %v1306_v61 = vsel %vm1292_vm9, %v1273_v51, %v1042_v16  ;;  %v3123_v16 = vld [vmem:[%s3297_s2] ss:$0 sm:$0xff]  ;;  %s2220_s2 = scalar_lea.hbm %s2219_s1, 1 }
 0x1ae   : > { %1991 = vmatmul.msk.bf16.gmra.mxu1 %vm1325_vm10, %v1306_v61  ;;  %v1439_v23 = vadd.f32 %v3123_v16, %v1438_v37  ;;  %v1437_v20 = vadd.f32 %v3123_v16, %v1436_v47  ;;  %v1442_v52 = vadd.f32 %v3123_v16, %v1441_v58  ;;  %v1444_v51 = vadd.f32 %v3123_v16, %v1443_v11  ;;  %p2221_p12 = scmp.ne.s32.totalorder %s2219_s1, %s2220_s2 }
 0x1b0   : > { %v1516_v61 = vmax.f32 %v1437_v20, 0.0  ;;  %p2222_p13 = pnand %p2221_p12, %p2410_p4 }
 0x1b2   : > { %p2223_p0 = pneg %p2222_p13 }
 0x1b3   : > { %v812_v21 = vpop.permute.xlu0 %811  ;;  %v931_v44 = vpop.permute.xlu1 %930 }
 0x1b4   : > { %v1116_v32 = vsel %vm1094_vm3, %v1083_v46, %v812_v21  ;;  %v1058_v24 = vpop.permute.xlu2 %1057  ;;  %v1448_v25 = vpop.f32.mrf.mxu0  ;;  %v1518_v21 = vmax.f32 %v1442_v52, 0.0  ;;  %v1519_v46 = vmax.f32 %v1444_v51, 0.0  ;;  %v2106_v51 = vld [vmem:[%s3282_s5 + $0x28] sm:$0xff] }
 0x1b5   : > { %v1149_v43 = vsel %vm1127_vm4, %v1116_v32, %v849_v5  ;;  %v1473_v5 = vpop.f32.mrf.mxu2  ;;  %v1449_v32 = vadd.f32 %v3123_v16, %v1448_v25 }
 0x1b6   : > { %v1182_v8 = vsel %vm1160_vm5, %v1149_v43, %v896_v12  ;;  %v1517_v12 = vmax.f32 %v1439_v23, 0.0 }
 0x1b7   : > { %v1215_v26 = vsel %vm1193_vm6, %v1182_v8, %v931_v44  ;;  %v1447_v44 = vadd.f32 %v3123_v16, %v1446_v42 }
 0x1b9   : > { %v1520_v43 = vmax.f32 %v1447_v44, 0.0 }
 0x1bb   : > { %v739_v15 = vpop.permute.xlu0 %738  ;;  %v857_v17 = vpop.permute.xlu1 %856 }
 0x1bc   : > { %v1091_v34 = vsel %vm1061_vm2, %v2770_v50, %v739_v15  ;;  %v859_v36 = vpop.permute.xlu2 %858  ;;  %v1451_v10 = vpop.f32.mrf.mxu0 }
 0x1bd   : > { %v1124_v31 = vsel %vm1094_vm3, %v1091_v34, %v820_v7  ;;  %v1549_v7 = vadd.f32 %v1517_v12, %v1516_v61 }
 0x1be   : > { %v1157_v18 = vsel %vm1127_vm4, %v1124_v31, %v857_v17 }
 0x1bf   : > { %v1550_v17 = vadd.f32 %v1549_v7, %v1518_v21 }
 0x1c1   : > { %v1551_v8 = vadd.f32 %v1550_v17, %v1519_v46 }
 0x1c3   : > { %v968_v3 = vpop.permute.xlu0 %967  ;;  %v1050_v38 = vpop.permute.xlu1 %1049 }
 0x1c4   : > { %v1248_v29 = vsel %vm1226_vm7, %v1215_v26, %v968_v3  ;;  %v978_v6 = vpop.permute.xlu2 %977  ;;  %v1453_v1 = vpop.f32.mrf.mxu0  ;;  %v1521_v26 = vmax.f32 %v1449_v32, 0.0 }
 0x1c5   : > { %v1281_v60 = vsel %vm1259_vm8, %v1248_v29, %v1015_v22  ;;  %v1452_v22 = vadd.f32 %v3123_v16, %v1451_v10  ;;  %v1454_v3 = vadd.f32 %v3123_v16, %v1453_v1  ;;  %v1476_v29 = vpop.f32.mrf.mxu2 }
 0x1c6   : > { %v1314_v40 = vsel %vm1292_vm9, %v1281_v60, %v1050_v38  ;;  %v1552_v60 = vadd.f32 %v1551_v8, %v1520_v43  ;;  %v1477_v10 = vadd.f32 %v3123_v16, %v1476_v29  ;;  %v2105_v29 = vld [vmem:[%s3282_s5 + $0x20] sm:$0xff] }
 0x1c7   : > { %1995 = vmatmul.msk.bf16.gmra.mxu2 %vm1325_vm10, %v1314_v40  ;;  %v1522_v40 = vmax.f32 %v1452_v22, 0.0  ;;  %v1523_v31 = vmax.f32 %v1454_v3, 0.0 }
 0x1c8   : > { %v1532_v20 = vmax.f32 %v1477_v10, 0.0  ;;  %v2093_v10 = vld [vmem:[%s3298_s3] sm:$0xff] }
 0x1cb   : > { %v904_v27 = vpop.permute.xlu0 %903  ;;  %v1023_v0 = vpop.permute.xlu1 %1022 }
 0x1cc   : > { %v1190_v41 = vsel %vm1160_vm5, %v1157_v18, %v904_v27  ;;  %v1553_v27 = vadd.f32 %v1552_v60, %v1521_v26  ;;  %v2324_v60 = vmov 0.0  }
 0x1cd   : > { %v1223_v55 = vsel %vm1193_vm6, %v1190_v41, %v939_v19  ;;  %v1461_v59 = vpop.f32.mrf.mxu1  ;;  %v3134_v19 = vpop.f32.mrf.mxu3  ;;  %330 = vst [vmem:[#allocation2] sm:$0x1] %v2324_v60 }
 0x1ce   : > { %v1554_v41 = vadd.f32 %v1553_v27, %v1522_v40  ;;  %v1462_v47 = vadd.f32 %v3123_v16, %v1461_v59  ;;  %v2108_v59 = vld [vmem:[%s3282_s5 + $0x38] sm:$0xff]  ;;  %v1492_v40 = vadd.f32 %v3123_v16, %v3134_v19 }
 0x1cf   : > { %1738 = vmatpush.bf16.msrb.mxu2 %v2108_v59  ;;  %v2100_v27 = vld [vmem:[%s3298_s3 + $0x38] sm:$0xff] }
 0x1d0   : > { %1659 = vmatpush.bf16.msrb.mxu1 %v2100_v27 }
 0x1d3   : > { %v976_v30 = vpop.permute.xlu0 %975  ;;  %v822_v28 = vpop.permute.xlu1 %821 }
 0x1d4   : > { %v1256_v48 = vsel %vm1226_vm7, %v1223_v55, %v976_v30  ;;  %v1555_v30 = vadd.f32 %v1554_v41, %v1523_v31  ;;  %v2099_v41 = vld [vmem:[%s3298_s3 + $0x30] sm:$0xff] }
 0x1d5   : > { %v1289_v13 = vsel %vm1259_vm8, %v1256_v48, %v1023_v0  ;;  %v1463_v15 = vpop.f32.mrf.mxu1  ;;  %v1478_v48 = vpop.f32.mrf.mxu2  ;;  %1660 = vmatpush.bf16.msrb.mxu1 %v2099_v41 }
 0x1d6   : > { %v1322_v50 = vsel %vm1292_vm9, %v1289_v13, %v1058_v24  ;;  %v1479_v52 = vadd.f32 %v3123_v16, %v1478_v48  ;;  %v2098_v48 = vld [vmem:[%s3298_s3 + $0x28] sm:$0xff] }
 0x1d7   : > { %1999 = vmatmul.msk.bf16.gmra.mxu3 %vm1325_vm10, %v1322_v50 }
 0x1d9   : > { %1661 = vmatpush.bf16.msrb.mxu1 %v2098_v48 }
 0x1db   : > { %v741_v33 = vpop.permute.xlu0 %740  ;;  %v941_v62 = vpop.permute.xlu1 %940 }
 0x1dc   : > { %v1093_v2 = vsel %vm1061_vm2, %v2921_v14, %v741_v33 }
 0x1dd   : > { %v1126_v9 = vsel %vm1094_vm3, %v1093_v2, %v822_v28  ;;  %v1493_v28 = vpop.f32.mrf.mxu3  ;;  %v1526_v2 = vmax.f32 %v1462_v47, 0.0 }
 0x1de   : > { %v1159_v53 = vsel %vm1127_vm4, %v1126_v9, %v859_v36  ;;  %v1464_v36 = vadd.f32 %v3123_v16, %v1463_v15 }
 0x1e3   : > { %v906_v57 = vpop.permute.xlu0 %905  ;;  %v1060_v54 = vpop.permute.xlu1 %1059 }
 0x1e4   : > { %v1192_v49 = vsel %vm1160_vm5, %v1159_v53, %v906_v57  ;;  %v1527_v57 = vmax.f32 %v1464_v36, 0.0 }
 0x1e5   : > { %v1225_v45 = vsel %vm1193_vm6, %v1192_v49, %v941_v62 }
 0x1e6   : > { %v1258_v35 = vsel %vm1226_vm7, %v1225_v45, %v978_v6  ;;  %v1496_v6 = vpop.f32.mrf.mxu3 }
 0x1e7   : > { %v1497_v19 = vadd.f32 %v3123_v16, %v1496_v6 }
 0x1eb   : > { %v1025_v39 = vpop.permute.xlu0 %1024 }
 0x1ec   : > { %v1291_v14 = vsel %vm1259_vm8, %v1258_v35, %v1025_v39 }
 0x1ed   : > { %v1324_v63 = vsel %vm1292_vm9, %v1291_v14, %v1060_v54  ;;  %v1472_v54 = vadd.f32 %v3123_v16, %v1471_v56  ;;  %v2107_v56 = vld [vmem:[%s3282_s5 + $0x30] sm:$0xff] }
 0x1ee   : > { %2000 = vmatmul.msk.bf16.gmra.mxu3 %vm1325_vm10, %v1324_v63  ;;  %v1474_v63 = vadd.f32 %v3123_v16, %v1473_v5  ;;  %v1498_v1 = vpop.f32.mrf.mxu3  ;;  %1739 = vmatpush.bf16.msrb.mxu2 %v2107_v56  ;;  %v1533_v5 = vmax.f32 %v1479_v52, 0.0 }
 0x1ef   : > { %v1530_v14 = vmax.f32 %v1472_v54, 0.0  ;;  %v2102_v54 = vld [vmem:[%s3282_s5 + $0x8] sm:$0xff] }
 0x1f0   : > { %v1531_v25 = vmax.f32 %v1474_v63, 0.0 }
 0x1f2   : > { %1740 = vmatpush.bf16.msrb.mxu2 %v2106_v51 }
 0x1f6   : > { %1741 = vmatpush.bf16.msrb.mxu2 %v2105_v29 }
 0x202   : > { %v1456_v4 = vpop.f32.mrf.mxu0 }
 0x203   : > { %v1457_v34 = vadd.f32 %v3123_v16, %v1456_v4 }
 0x205   : > { %v1524_v55 = vmax.f32 %v1457_v34, 0.0 }
 0x207   : > { %v1556_v13 = vadd.f32 %v1555_v30, %v1524_v55 }
 0x20a   : > { %v1458_v38 = vpop.f32.mrf.mxu0 }
 0x20b   : > { %v1459_v0 = vadd.f32 %v3123_v16, %v1458_v38 }
 0x20d   : > { %v1525_v24 = vmax.f32 %v1459_v0, 0.0  ;;  %v1538_v0 = vmax.f32 %v1492_v40, 0.0 }
 0x20f   : > { %v1557_v50 = vadd.f32 %v1556_v13, %v1525_v24  ;;  %v1540_v13 = vmax.f32 %v1497_v19, 0.0 }
 0x211   : > { %v1558_v62 = vadd.f32 %v1557_v50, %v1526_v2  ;;  %v1499_v50 = vadd.f32 %v3123_v16, %v1498_v1 }
 0x213   : > { %v1559_v58 = vadd.f32 %v1558_v62, %v1527_v57  ;;  %v1541_v2 = vmax.f32 %v1499_v50, 0.0  ;;  %v2104_v62 = vld [vmem:[%s3282_s5 + $0x18] sm:$0xff] }
 0x214   : > { %1742 = vmatpush.bf16.msrb.mxu2 %v2104_v62 }
 0x218   : > { %v1481_v53 = vpop.f32.mrf.mxu2 }
 0x219   : > { %v1482_v61 = vadd.f32 %v3123_v16, %v1481_v53 }
 0x21b   : > { %v1534_v7 = vmax.f32 %v1482_v61, 0.0 }
 0x220   : > { %v1483_v11 = vpop.f32.mrf.mxu2 }
 0x221   : > { %v1484_v46 = vadd.f32 %v3123_v16, %v1483_v11 }
 0x223   : > { %v1535_v22 = vmax.f32 %v1484_v46, 0.0 }
 0x229   : > { %v1501_v21 = vpop.f32.mrf.mxu3 }
 0x22a   : > { %v1502_v36 = vadd.f32 %v3123_v16, %v1501_v21 }
 0x22b   : > { %v1466_v18 = vpop.f32.mrf.mxu1 }
 0x22c   : > { %v1467_v37 = vadd.f32 %v3123_v16, %v1466_v18  ;;  %v1494_v18 = vadd.f32 %v3123_v16, %v1493_v28  ;;  %v2097_v28 = vld [vmem:[%s3298_s3 + $0x20] sm:$0xff]  ;;  %v1542_v53 = vmax.f32 %v1502_v36, 0.0 }
 0x22d   : > { %1662 = vmatpush.bf16.msrb.mxu1 %v2097_v28 }
 0x22e   : > { %v1528_v49 = vmax.f32 %v1467_v37, 0.0  ;;  %v1539_v24 = vmax.f32 %v1494_v18, 0.0 }
 0x230   : > { %v1560_v35 = vadd.f32 %v1559_v58, %v1528_v49  ;;  %v2103_v58 = vld [vmem:[%s3282_s5 + $0x10] sm:$0xff] }
 0x231   : > { %v1503_v38 = vpop.f32.mrf.mxu3  ;;  %1743 = vmatpush.bf16.msrb.mxu2 %v2103_v58 }
 0x232   : > { %v1504_v49 = vadd.f32 %v3123_v16, %v1503_v38  ;;  %v1689_v38 = vld [vmem:[%s3283_s6] sm:$0x1] }
 0x233   : > { %v1468_v33 = vpop.f32.mrf.mxu1 }
 0x234   : > { %v1469_v9 = vadd.f32 %v3123_v16, %v1468_v33 }
 0x235   : > { %1744 = vmatpush.bf16.msrb.mxu2 %v2102_v54 }
 0x236   : > { %v1529_v45 = vmax.f32 %v1469_v9, 0.0  ;;  %v2096_v9 = vld [vmem:[%s3298_s3 + $0x18] sm:$0xff] }
 0x237   : > { %1663 = vmatpush.bf16.msrb.mxu1 %v2096_v9 }
 0x238   : > { %v1561_v39 = vadd.f32 %v1560_v35, %v1529_v45  ;;  %v2095_v45 = vld [vmem:[%s3298_s3 + $0x10] sm:$0xff]  ;;  %v2094_v35 = vld [vmem:[%s3298_s3 + $0x8] sm:$0xff] }
 0x23a   : > { %v1562_v42 = vadd.f32 %v1561_v39, %v1530_v14  ;;  %v1543_v39 = vmax.f32 %v1504_v49, 0.0 }
 0x23b   : > { %1664 = vmatpush.bf16.msrb.mxu1 %v2095_v45 }
 0x23c   : > { %v1563_v23 = vadd.f32 %v1562_v42, %v1531_v25  ;;  %v2101_v25 = vld [vmem:[%s3282_s5] sm:$0xff] }
 0x23d   : > { %1745 = vmatpush.bf16.msrb.mxu2 %v2101_v25 }
 0x23e   : > { %v1564_v4 = vadd.f32 %v1563_v23, %v1532_v20 }
 0x23f   : > { %1665 = vmatpush.bf16.msrb.mxu1 %v2094_v35 }
 0x240   : > { %v1565_v44 = vadd.f32 %v1564_v4, %v1533_v5 }
 0x242   : > { %v1566_v15 = vadd.f32 %v1565_v44, %v1534_v7 }
 0x243   : > { %1666 = vmatpush.bf16.msrb.mxu1 %v2093_v10 }
 0x244   : > { %v1567_v26 = vadd.f32 %v1566_v15, %v1535_v22  ;;  %v1548_v15 = vld [vmem:[#allocation2] sm:$0x1] }
 0x24a   : > { %v1486_v12 = vpop.f32.mrf.mxu2 }
 0x24b   : > { %v1487_v32 = vadd.f32 %v3123_v16, %v1486_v12 }
 0x24d   : > { %v1536_v8 = vmax.f32 %v1487_v32, 0.0 }
 0x24f   : > { %v1568_v34 = vadd.f32 %v1567_v26, %v1536_v8 }
 0x252   : > { %v1488_v17 = vpop.f32.mrf.mxu2 }
 0x253   : > { %v1489_v43 = vadd.f32 %v3123_v16, %v1488_v17 }
 0x255   : > { %v1537_v3 = vmax.f32 %v1489_v43, 0.0 }
 0x257   : > { %v1569_v31 = vadd.f32 %v1568_v34, %v1537_v3 }
 0x259   : > { %v1570_v55 = vadd.f32 %v1569_v31, %v1538_v0 }
 0x25a   : > { %v1506_v30 = vpop.f32.mrf.mxu3 }
 0x25b   : > { %v1571_v47 = vadd.f32 %v1570_v55, %v1539_v24  ;;  %v1507_v14 = vadd.f32 %v3123_v16, %v1506_v30 }
 0x25d   : > { %v1572_v33 = vadd.f32 %v1571_v47, %v1540_v13  ;;  %v1544_v1 = vmax.f32 %v1507_v14, 0.0 }
 0x25f   : > { %v1573_v57 = vadd.f32 %v1572_v33, %v1541_v2 }
 0x261   : > { %v1574_v6 = vadd.f32 %v1573_v57, %v1542_v53 }
 0x262   : > { %v1508_v37 = vpop.f32.mrf.mxu3 }
 0x263   : > { %v1575_v11 = vadd.f32 %v1574_v6, %v1543_v39  ;;  %v1509_v42 = vadd.f32 %v3123_v16, %v1508_v37 }
 0x265   : > { %v1576_v23 = vadd.f32 %v1575_v11, %v1544_v1  ;;  %v1545_v56 = vmax.f32 %v1509_v42, 0.0 }
 0x267   : > { %v1577_v4 = vadd.f32 %v1576_v23, %v1545_v56 }
 0x271   : > { %v1511_v63 = vpop.f32.mrf.mxu3 }
 0x272   : > { %v1512_v59 = vadd.f32 %v3123_v16, %v1511_v63 }
 0x274   : > { %v1546_v20 = vmax.f32 %v1512_v59, 0.0 }
 0x276   : > { %v1578_v51 = vadd.f32 %v1577_v4, %v1546_v20 }
 0x279   : > { %v1513_v52 = vpop.f32.mrf.mxu3 }
 0x27a   : > { %v1514_v12 = vadd.f32 %v3123_v16, %v1513_v52  ;;  %v1610_v16 = vld [vmem:[%s3281_s4] sm:$0x1] }
 0x27c   : > { %v1547_v5 = vmax.f32 %v1514_v12, 0.0 }
 0x27e   : > { %v1579_v61 = vadd.f32 %v1578_v51, %v1547_v5 }
 0x280   : > { %v1580_v21 = vrot.slane %v1579_v61, 4 }
 0x282   : > { %v1581_v44 = vadd.f32 %v1580_v21, %v1579_v61 }
 0x284   : > { %v1582_v7 = vrot.slane %v1581_v44, 2 }
 0x286   : > { %v1583_v46 = vadd.f32 %v1582_v7, %v1581_v44 }
 0x288   : > { %v1584_v32 = vrot.slane %v1583_v46, 1 }
 0x28a   : > { %v1585_v17 = vadd.f32 %v1584_v32, %v1583_v46 }
 0x28c   : > { %v1586_v43 = vadd.f32 %v1585_v17, %v1548_v15 }
 0x28e   : > { %1587 = vst [vmem:[#allocation2] sm:$0x1] %v1586_v43 }
 0x295   : > { %v1591_v22 = vld [vmem:[#allocation2] sm:$0x1] }
 0x296   : > { %v1592_v8 = vmul.f32 0.00390625, %v1591_v22 }
 0x298   : > { %v1593_v26 = vpack.c.bf16 %v1592_v8, %v1592_v8 }
 0x29a   : > { %1667 = vmatmul.bf16.vlgmr.msrb.gmra.mxu1 %v1593_v26  ;;  %1746 = vmatmul.bf16.vlgmr.msrb.gmra.mxu2 %v1593_v26 }
 0x317   : > { %v1668_v3 = vpop.f32.mrf.mxu1 }
 0x318   : > { %v1669_v29 = vadd.f32 %v1668_v3, %v1610_v16 }
 0x31a   : > { %1672 = vst [vmem:[%s313_s12] sm:$0x1] %v1669_v29  ;;  %s2224_s12 = scalar_lea.hbm %s3284_s7, 2 }
 0x31b   : > { %p2226_p2 = scmp.lt.s32.totalorder %s2224_s12, %s2220_s2 }
 0x31d   : > { %p2227_p3 = por %p2226_p2, %p2225_p1 }
 0x31f   : > { %p2228_p5 = pnand %p2227_p3, %p2223_p0 }
 0x321   : > { %2231 = shalt.err (!%p2228_p5)
}
 0x322   : > { %2134 = dma.vmem_to_hbm [thread:$0]  (%p2410_p4), %s1768_s14, 16, %s1770_s16, %s1753_s25   ;;  %v1747_v60 = vpop.f32.mrf.mxu2  ;;  %v1670_v34 = vpop.f32.mrf.mxu1 }
 0x323   : > { %v1748_v40 = vadd.f32 %v1747_v60, %v1689_v38  ;;  %s1757_s20 = scalar_lea.sflag [#allocation6], %s3209_s21  ;;  %s2246_s3 = sshra.s32 %s1783_s0, 4  ;;  %s2247_s3 = int_to_ptr.hbm [resolvable:$true] %s2246_s3 }
 0x324   : > { %s2248_s1 = scalar_lea.hbm %s2247_s3, 1  ;;  %s2252_s11 = scalar_lea.hbm %s3285_s8, 2 }
 0x325   : > { %1751 = vst [vmem:[%s319_s24] sm:$0x1] %v1748_v40  ;;  %p2249_p6 = scmp.ne.s32.totalorder %s2247_s3, %s2248_s1  ;;  %p2253_p10 = scmp.lt.s32.totalorder %s2247_s3, %s3285_s8 }
 0x326   : > { %p2254_p11 = scmp.lt.s32.totalorder %s2252_s11, %s2248_s1 }
 0x327   : > { %p2250_p7 = pnand %p2249_p6, %p2410_p4 }
 0x328   : > { %p2255_p12 = por %p2254_p11, %p2253_p10 }
 0x329   : > { %p2251_p9 = pneg %p2250_p7 }
 0x32b   : > { %p2256_p13 = pnand %p2255_p12, %p2251_p9 }
 0x32d   : > { %2259 = shalt.err (!%p2256_p13)
}
 0x32e   : > { %2135 = dma.vmem_to_hbm [thread:$0]  (%p2410_p4), %s1781_s23, 16, %s1783_s0, %s1757_s20   ;;  %v1749_v27 = vpop.f32.mrf.mxu2 }
 0x32f PF: > { %p2145_p0 = scmp.ge.s32.totalorder %s2314_s10, 2  ;;  %s1794_s21 = sand.u32 1, %s2294_s27  }
 0x330   : > { %s1795_s16 = scalar_lea.sflag [#allocation4], %s1794_s21 }
 0x331   : > { %p2139_p1 = pnand %p2145_p0, %p2417_p8 }
 0x333   : > { %p2140_p2 = pneg %p2139_p1 }
 0x335   : > { %2285 = dma.done.wait (%p2140_p2), %s1795_s16, 16  }
 0x336   : > { %2287 = vsyncadd (%p2140_p2), %s1795_s16, 4294967280  ;;  %s1804_s24 = scalar_lea.sflag [#allocation6], %s1794_s21 }
 0x337   : > { %2289 = dma.done.wait (%p2140_p2), %s1804_s24, 16  }
 0x338   : > { %2291 = vsyncadd (%p2140_p2), %s1804_s24, 4294967280  ;;  %s25_s10 = sadd.s32 1, %s2314_s10   ;;  %s3299_s27 = smov %s2298_s28 }
 0x339   : > { %p22_p3 = scmp.ge.s32.totalorder %s25_s10, 4   ;;  %s3300_s28 = smov %s2302_s29 }
 0x33a   : > { %s3301_s29 = smov %s2423_s18  ;;  %s3302_s30 = smov %s2310_s9 }
 0x33b   : > { %s3303_s9 = smov %s3305_s13  ;;  %24 = sbr.rel (!%p22_p3) target bundleno = 11 (0xb), region = 109 }
 0x340   :  { %1809 = vsyncpa [#allocation4], 1 }
 0x341   :  { %1811 = vsyncpa [#allocation4 + $0x1], 1 }
 0x342   :  { %1812 = vsyncpa [#allocation6], 1 }
 0x343   :  { %1814 = vsyncpa [#allocation6 + $0x1], 1 }

</bundles_post_ra>
